<compile_context>
chip_gen: v7x
topology: tpu7x:2x2x1
jax: 0.10.0
libtpu: 0.0.40
codegen_flags: <defaults>
</compile_context>

<pallas_src>
import functools

import jax
import jax.numpy as jnp
from jax.experimental import pallas as pl
from jax.experimental.pallas import tpu as pltpu


# ------------------------------ Pallas kernels ------------------------------

def _conv_kernel(x_ref, w_ref, scale_ref, shift_ref, bias_ref,
                 out_ref, stats_ref, xpad_ref, *,
                 kh, kw, pad, th, wo, fuse_bn_relu, add_bias):
    """Stride-1 conv as kh*kw shifted matmuls over a VMEM-resident padded image.

    x_ref     : (1, H, W, Cin)      input image (stays resident across row tiles)
    w_ref     : (kh*kw, Cin, Cout)  weights, tap-major
    scale_ref : (1, Cin), shift_ref: (1, Cin)  fused input BN affine (+ReLU)
    bias_ref  : (1, Cout)           conv bias (identity branch only)
    out_ref   : (1, th, Wo, Cout)   output row tile
    stats_ref : (1, 1, 2, Cout)     per-tile [sum, sum_sq] of the conv output
    xpad_ref  : (H+2p, W+2p, Cin)   VMEM scratch holding the zero-padded image
    """
    t = pl.program_id(1)
    h = x_ref.shape[1]
    w_in = x_ref.shape[2]
    cin = x_ref.shape[3]
    cout = w_ref.shape[2]

    # Build the padded (and optionally BN+ReLU'd) image once per image; the
    # scratch persists across the (sequential, "arbitrary") row-tile axis.
    @pl.when(t == 0)
    def _fill():
        x = x_ref[0]                                         # (H, W, Cin)
        if fuse_bn_relu:
            x = jnp.maximum(x * scale_ref[...] + shift_ref[...], 0.0)
        if pad > 0:
            xpad_ref[...] = jnp.zeros(xpad_ref.shape, xpad_ref.dtype)
            xpad_ref[pl.ds(pad, h), pl.ds(pad, w_in), :] = x
        else:
            xpad_ref[...] = x

    r0 = t * th
    acc = jnp.zeros((th * wo, cout), jnp.float32)
    for i in range(kh):                                      # unrolled tap loop
        for j in range(kw):
            patch = xpad_ref[pl.ds(r0 + i, th), pl.ds(j, wo), :]   # (th, wo, cin)
            acc = acc + jnp.dot(patch.reshape(th * wo, cin),
                                w_ref[i * kw + j],
                                preferred_element_type=jnp.float32)
    if add_bias:
        acc = acc + bias_ref[...]

    out_ref[...] = acc.reshape(1, th, wo, cout)
    s1 = jnp.sum(acc, axis=0, keepdims=True)                 # (1, Cout)
    s2 = jnp.sum(acc * acc, axis=0, keepdims=True)           # (1, Cout)
    stats_ref[...] = jnp.concatenate([s1, s2], axis=0).reshape(1, 1, 2, cout)


def _bn_res_leaky_kernel(h_ref, id_ref, scale_ref, shift_ref, o_ref, *, slope):
    # y = BN2(h) + identity ; LeakyReLU(y)    (per-channel affine pre-folded)
    y = h_ref[...] * scale_ref[...] + shift_ref[...] + id_ref[...]
    o_ref[...] = jnp.where(y > 0, y, slope * y)


# ------------------------------ kernel wrappers ------------------------------

def _pick_row_tile(ho, wo, max_elems=2048):
    th = min(ho, max(1, max_elems // max(wo, 1)))
    while ho % th:
        th -= 1
    return max(th, 1)


def conv_bn_stats(x, w_taps, *, kh, kw, pad, scale=None, shift=None, bias=None,
                  fuse_bn_relu=False, add_bias=False):
    """Stride-1 conv (kh x kw, zero pad) on NHWC x, emitting BN stats of its output.

    Returns (out_NHWC, stats) with stats[n, t] = [per-channel sum, sum of squares]
    of the output rows in tile (n, t).  Optionally fuses a per-channel affine+ReLU
    on the *input* (previous layer's BN) and a conv bias on the output.
    """
    n, h, w, cin = x.shape
    kk, cin2, cout = w_taps.shape
    assert kk == kh * kw and cin2 == cin
    hp, wp = h + 2 * pad, w + 2 * pad
    ho, wo = hp - kh + 1, wp - kw + 1
    th = _pick_row_tile(ho, wo)
    n_t = ho // th

    if scale is None:
        scale = jnp.ones((cin,), jnp.float32)
    if shift is None:
        shift = jnp.zeros((cin,), jnp.float32)
    if bias is None:
        bias = jnp.zeros((cout,), jnp.float32)

    kern = functools.partial(_conv_kernel, kh=kh, kw=kw, pad=pad, th=th, wo=wo,
                             fuse_bn_relu=fuse_bn_relu, add_bias=add_bias)
    # NOTE: whole-image-resident input blocks are fine at MNIST-scale ResNet sizes;
    # for very large spatial inputs this would switch to halo'd row blocks.
    out, stats = pl.pallas_call(
        kern,
        out_shape=(jax.ShapeDtypeStruct((n, ho, wo, cout), jnp.float32),
                   jax.ShapeDtypeStruct((n, n_t, 2, cout), jnp.float32)),
        grid=(n, n_t),
        in_specs=[
            pl.BlockSpec((1, h, w, cin), lambda b, t: (b, 0, 0, 0)),
            pl.BlockSpec((kk, cin, cout), lambda b, t: (0, 0, 0)),
            pl.BlockSpec((1, cin), lambda b, t: (0, 0)),
            pl.BlockSpec((1, cin), lambda b, t: (0, 0)),
            pl.BlockSpec((1, cout), lambda b, t: (0, 0)),
        ],
        out_specs=(
            pl.BlockSpec((1, th, wo, cout), lambda b, t: (b, t, 0, 0)),
            pl.BlockSpec((1, 1, 2, cout), lambda b, t: (b, t, 0, 0)),
        ),
        scratch_shapes=[pltpu.VMEM((hp, wp, cin), jnp.float32)],
        compiler_params=pltpu.CompilerParams(
            dimension_semantics=("parallel", "arbitrary")),
    )(x, w_taps, scale.reshape(1, cin), shift.reshape(1, cin),
      bias.reshape(1, cout))
    return out, stats


def bn_fold(stats, count, gamma, beta, eps=1e-5):
    """Fold accumulated (sum, sum_sq) into per-channel scale/shift (training BN)."""
    s = jnp.sum(stats[:, :, 0, :], axis=(0, 1))
    ss = jnp.sum(stats[:, :, 1, :], axis=(0, 1))
    mean = s / count
    var = ss / count - mean * mean                 # biased variance
    scale = gamma * jax.lax.rsqrt(var + eps)
    shift = beta - mean * scale
    return scale, shift


def bn_residual_leaky(h_rows, ident_rows, scale, shift, slope=0.01):
    """Fused BN2-affine + residual add + LeakyReLU on a lane-dense view."""
    m, c = h_rows.shape
    if c < 128 and 128 % c == 0 and (m * c) % 128 == 0:
        lanes = 128
        rows = m * c // 128
        rep = 128 // c
        h2 = h_rows.reshape(rows, lanes)
        id2 = ident_rows.reshape(rows, lanes)
        sc = jnp.tile(scale, rep).reshape(1, lanes)    # channel pattern repeats
        sh = jnp.tile(shift, rep).reshape(1, lanes)
    else:
        lanes, rows = c, m
        h2, id2 = h_rows, ident_rows
        sc, sh = scale.reshape(1, c), shift.reshape(1, c)
    tm = rows if rows <= 512 else 512
    out = pl.pallas_call(
        functools.partial(_bn_res_leaky_kernel, slope=slope),
        out_shape=jax.ShapeDtypeStruct((rows, lanes), jnp.float32),
        grid=(pl.cdiv(rows, tm),),
        in_specs=[
            pl.BlockSpec((tm, lanes), lambda i: (i, 0)),
            pl.BlockSpec((tm, lanes), lambda i: (i, 0)),
            pl.BlockSpec((1, lanes), lambda i: (0, 0)),
            pl.BlockSpec((1, lanes), lambda i: (0, 0)),
        ],
        out_specs=pl.BlockSpec((tm, lanes), lambda i: (i, 0)),
        compiler_params=pltpu.CompilerParams(dimension_semantics=("parallel",)),
    )(h2, id2, sc, sh)
    return out.reshape(m, c)


# ------------------------------ weight preprocessing ------------------------------

def _space_to_depth(x):
    """(N, H, W, C) -> (N, H/2, W/2, 4C), channel = (pi*2+pj)*C + c."""
    n, h, w, c = x.shape
    if h % 2 or w % 2:
        x = jnp.pad(x, ((0, 0), (0, h % 2), (0, w % 2), (0, 0)))
        n, h, w, c = x.shape
    x = x.reshape(n, h // 2, 2, w // 2, 2, c)
    x = jnp.transpose(x, (0, 1, 3, 2, 4, 5))
    return x.reshape(n, h // 2, w // 2, 4 * c)


def _conv_w_taps(w_oihw):
    """(Cout, Cin, kh, kw) -> (kh*kw, Cin, Cout) in the kernel's tap order."""
    cout, cin, kh, kw = w_oihw.shape
    return jnp.transpose(w_oihw, (2, 3, 1, 0)).reshape(kh * kw, cin, cout)


def _conv3x3_s2_as_s2d_taps(w_oihw):
    """3x3/stride2/pad1 conv == 2x2/stride1 conv on space_to_depth(pad(x, 1))."""
    cout, cin, kh, kw = w_oihw.shape
    assert kh == 3 and kw == 3
    wp = jnp.pad(w_oihw, ((0, 0), (0, 0), (0, 1), (0, 1)))    # (Cout, Cin, 4, 4)
    w6 = wp.reshape(cout, cin, 2, 2, 2, 2)                    # (o, i, di, pi, dj, pj)
    w6 = jnp.transpose(w6, (2, 4, 3, 5, 1, 0))                # (di, dj, pi, pj, i, o)
    return w6.reshape(4, 4 * cin, cout)


# ------------------------------ ResBlock module ------------------------------

class ResBlockPallas:
    def __init__(self, in_channels, out_channels, stride=1, key=None):
        assert stride in (1, 2)
        self.stride = stride
        self.descent = stride - 1
        self.in_channels = in_channels
        self.out_channels = out_channels
        if key is None:
            key = jax.random.PRNGKey(0)
        ks = jax.random.split(key, 10)

        def conv_params(k, cout, cin, kh, kw):
            kw_, kb_ = jax.random.split(k)
            w = jax.random.normal(kw_, (cout, cin, kh, kw), jnp.float32) * 0.1
            b = jax.random.normal(kb_, (cout,), jnp.float32) * 0.05
            return w, b

        self.w1, self.b1 = conv_params(ks[0], out_channels, in_channels, 3, 3)
        self.w2, self.b2 = conv_params(ks[1], out_channels, out_channels, 3, 3)
        self.wx1, self.bx1 = conv_params(ks[2], out_channels, in_channels, 1, 1)
        self.wx2, self.bx2 = conv_params(ks[3], out_channels, out_channels, 2, 2)
        self.g1 = 1.0 + 0.1 * jax.random.normal(ks[4], (out_channels,), jnp.float32)
        self.be1 = 0.1 * jax.random.normal(ks[5], (out_channels,), jnp.float32)
        self.g2 = 1.0 + 0.1 * jax.random.normal(ks[6], (out_channels,), jnp.float32)
        self.be2 = 0.1 * jax.random.normal(ks[7], (out_channels,), jnp.float32)

        # --- kernel weight layouts, precomputed once at init ---
        # b1/b2 are intentionally unused on the main branch: a conv bias followed by
        # training-mode BatchNorm is exactly cancelled by the mean subtraction.
        self.w2_taps = _conv_w_taps(self.w2)                      # (9, Cout, Cout)
        if stride == 2:
            self.w1_taps = _conv3x3_s2_as_s2d_taps(self.w1)       # (4, 4*Cin, Cout)
            # Compose px1 (1x1) and px2 (2x2/s2) into one conv; express it as a
            # 1x1 conv on the space-to-depth input (bias folded).
            w_comb = jnp.einsum('ocjk,ci->oijk', self.wx2, self.wx1[:, :, 0, 0])
            self.b_id = self.bx2 + jnp.einsum('ocjk,c->o', self.wx2, self.bx1)
            self.w_id = jnp.transpose(w_comb, (2, 3, 1, 0)).reshape(
                1, 4 * in_channels, out_channels)                 # (1, 4*Cin, Cout)
        else:
            self.w1_taps = _conv_w_taps(self.w1)                  # (9, Cin, Cout)

        self._jit_forward = jax.jit(self._forward)

    def _forward(self, x_nchw):
        n, cin, _, _ = x_nchw.shape
        cout = self.out_channels
        x = jnp.transpose(x_nchw, (0, 2, 3, 1))                   # NHWC

        # ---- conv1 (BN1 stats fused into the conv grid) ----
        if self.stride == 2:
            x1 = _space_to_depth(jnp.pad(x, ((0, 0), (1, 1), (1, 1), (0, 0))))
            h1, stats1 = conv_bn_stats(x1, self.w1_taps, kh=2, kw=2, pad=0)
        else:
            h1, stats1 = conv_bn_stats(x, self.w1_taps, kh=3, kw=3, pad=1)
        _, ho, wo, _ = h1.shape
        scale1, shift1 = bn_fold(stats1, n * ho * wo, self.g1, self.be1)

        # ---- conv2 with BN1 affine + ReLU fused into its input load ----
        h2, stats2 = conv_bn_stats(h1, self.w2_taps, kh=3, kw=3, pad=1,
                                   scale=scale1, shift=shift1, fuse_bn_relu=True)
        scale2, shift2 = bn_fold(stats2, n * ho * wo, self.g2, self.be2)

        # ---- identity branch ----
        if self.descent != 0:
            xs = _space_to_depth(x)                               # (N, H/2, W/2, 4*Cin)
            ident, _ = conv_bn_stats(xs, self.w_id, kh=1, kw=1, pad=0,
                                     bias=self.b_id, add_bias=True)
        else:
            assert cin == cout, "stride=1 identity path requires Cin == Cout"
            ident = x

        # ---- BN2 affine + residual add + LeakyReLU, lane-dense ----
        y_rows = bn_residual_leaky(h2.reshape(-1, cout), ident.reshape(-1, cout),
                                   scale2, shift2, slope=0.01)
        return jnp.transpose(y_rows.reshape(n, ho, wo, cout), (0, 3, 1, 2))

    def __call__(self, x_nchw):
        return self._jit_forward(x_nchw)


# ------------------------------ reference (plain JAX) ------------------------------

def _ref_resblock(x, m: ResBlockPallas):
    def conv(x, w, b, s, p):
        y = jax.lax.conv_general_dilated(
            x, w, (s, s), [(p, p), (p, p)],
            dimension_numbers=("NCHW", "OIHW", "NCHW"))
        return y + b.reshape(1, -1, 1, 1)

    def bn(x, g, be, eps=1e-5):
        mean = x.mean(axis=(0, 2, 3), keepdims=True)
        var = x.var(axis=(0, 2, 3), keepdims=True)   # biased, matches training BN
        return (x - mean) / jnp.sqrt(var + eps) * g.reshape(1, -1, 1, 1) + be.reshape(1, -1, 1, 1)

    out = jnp.maximum(bn(conv(x, m.w1, m.b1, m.stride, 1), m.g1, m.be1), 0.0)
    out = bn(conv(out, m.w2, m.b2, 1, 1), m.g2, m.be2)
    if m.descent != 0:
        ident = conv(conv(x, m.wx1, m.bx1, 1, 0), m.wx2, m.bx2, 2, 0)
    else:
        ident = x
    y = out + ident
    return jnp.where(y > 0, y, 0.01 * y)


# ------------------------------ main ------------------------------

if __name__ == "__main__":
    key = jax.random.PRNGKey(0)
    kx, kp1, kp2 = jax.random.split(key, 3)

    # Case 1: stride=2 (projection identity branch, px1/px2 composed)
    x = jax.random.normal(kx, (2, 4, 16, 16), jnp.float32)
    block = ResBlockPallas(in_channels=4, out_channels=8, stride=2, key=kp1)
    y = jax.block_until_ready(block(x))
    y_ref = _ref_resblock(x, block)
    assert y.shape == (2, 8, 8, 8), y.shape
    assert jnp.allclose(y, y_ref, atol=1e-4, rtol=1e-4), float(jnp.max(jnp.abs(y - y_ref)))

    # Case 2: stride=1 (pure identity skip; requires in_channels == out_channels)
    x2 = jax.random.normal(kx, (2, 8, 16, 16), jnp.float32)
    block2 = ResBlockPallas(in_channels=8, out_channels=8, stride=1, key=kp2)
    y2 = jax.block_until_ready(block2(x2))
    y2_ref = _ref_resblock(x2, block2)
    assert y2.shape == (2, 8, 16, 16), y2.shape
    assert jnp.allclose(y2, y2_ref, atol=1e-4, rtol=1e-4), float(jnp.max(jnp.abs(y2 - y2_ref)))

    print("KERNEL_OK")
</pallas_src>

<mosaic_0001>
module attributes {stable_mosaic.version = 11 : i64} {
  func.func @_conv_kernel(%arg0: i32, %arg1: i32, %arg2: memref<1x9x9x16xf32, #tpu.memory_space<vmem>>, %arg3: memref<4x16x8xf32, #tpu.memory_space<vmem>>, %arg4: memref<1x16xf32, #tpu.memory_space<vmem>>, %arg5: memref<1x16xf32, #tpu.memory_space<vmem>>, %arg6: memref<1x8xf32, #tpu.memory_space<vmem>>, %arg7: memref<1x8x8x8xf32, #tpu.memory_space<vmem>>, %arg8: memref<1x1x2x8xf32, #tpu.memory_space<vmem>>, %arg9: memref<9x9x16xf32, #tpu.memory_space<vmem>>) attributes {dimension_semantics = [#tpu.dimension_semantics<parallel>, #tpu.dimension_semantics<arbitrary>], iteration_bounds = array<i64: 2, 1>, scalar_prefetch = 0 : i64, scratch_operands = 1 : i64, tpu.core_type = #tpu.core_type<tc>, window_params = [{transform_indices = @transform_0, window_bounds = array<i64: 1, 9, 9, 16>}, {pipeline_mode = #tpu.pipeline_mode<synchronous>, transform_indices = @transform_1, window_bounds = array<i64: 4, 16, 8>}, {pipeline_mode = #tpu.pipeline_mode<synchronous>, transform_indices = @transform_2, window_bounds = array<i64: 1, 16>}, {pipeline_mode = #tpu.pipeline_mode<synchronous>, transform_indices = @transform_3, window_bounds = array<i64: 1, 16>}, {pipeline_mode = #tpu.pipeline_mode<synchronous>, transform_indices = @transform_4, window_bounds = array<i64: 1, 8>}, {transform_indices = @transform_5, window_bounds = array<i64: 1, 8, 8, 8>}, {transform_indices = @transform_6, window_bounds = array<i64: 1, 1, 2, 8>}]} {
    %c0_i32 = arith.constant 0 : i32
    %0 = arith.cmpi eq, %arg1, %c0_i32 : i32
    %1 = arith.extui %0 : i1 to i32
    %c0_i32_0 = arith.constant 0 : i32
    %2 = arith.cmpi ne, %1, %c0_i32_0 : i32
    scf.if %2 {
      %c0_34 = arith.constant 0 : index
      %c0_35 = arith.constant 0 : index
      %c0_36 = arith.constant 0 : index
      %c0_37 = arith.constant 0 : index
      %47 = vector.load %arg2[%c0_34, %c0_35, %c0_36, %c0_37] : memref<1x9x9x16xf32, #tpu.memory_space<vmem>>, vector<1x9x9x16xf32>
      %48 = vector.shape_cast %47 : vector<1x9x9x16xf32> to vector<9x9x16xf32>
      %c0_38 = arith.constant 0 : index
      %c0_39 = arith.constant 0 : index
      %c0_40 = arith.constant 0 : index
      %49 = vector.load %arg9[%c0_38, %c0_39, %c0_40] : memref<9x9x16xf32, #tpu.memory_space<vmem>>, vector<9x9x16xf32>
      tpu.vector_store %arg9[%c0_38, %c0_39, %c0_40], %48 {strides = array<i32>} : memref<9x9x16xf32, #tpu.memory_space<vmem>>, vector<9x9x16xf32>,
    } else {
    }
    %c8_i32 = arith.constant 8 : i32
    %3 = arith.muli %arg1, %c8_i32 : i32
    %cst = arith.constant 0.000000e+00 : f32
    %4 = vector.broadcast %cst : f32 to vector<64x8xf32>
    %c0_i32_1 = arith.constant 0 : i32
    %5 = arith.addi %3, %c0_i32_1 : i32
    %6 = arith.index_cast %5 : i32 to index
    %c0 = arith.constant 0 : index
    %c0_2 = arith.constant 0 : index
    %7 = vector.load %arg9[%6, %c0, %c0_2] : memref<9x9x16xf32, #tpu.memory_space<vmem>>, vector<8x8x16xf32>
    %8 = vector.shape_cast %7 : vector<8x8x16xf32> to vector<64x16xf32>
    %c0_3 = arith.constant 0 : index
    %c0_4 = arith.constant 0 : index
    %c0_5 = arith.constant 0 : index
    %9 = vector.load %arg3[%c0_3, %c0_4, %c0_5] : memref<4x16x8xf32, #tpu.memory_space<vmem>>, vector<1x16x8xf32>
    %10 = vector.shape_cast %9 : vector<1x16x8xf32> to vector<16x8xf32>
    %cst_6 = arith.constant dense<0.000000e+00> : vector<64x8xf32>
    %11 = tpu.matmul %8, %10, %cst_6 {dimension_numbers = #tpu.dot_dimension_numbers<[1], [0], [0], [1], [0, 0, 1, 1], [], []>} : vector<64x16xf32>, vector<16x8xf32>, vector<64x8xf32> -> vector<64x8xf32>
    %12 = arith.addf %4, %11 : vector<64x8xf32>
    %c0_i32_7 = arith.constant 0 : i32
    %13 = arith.addi %3, %c0_i32_7 : i32
    %14 = arith.index_cast %13 : i32 to index
    %c1 = arith.constant 1 : index
    %c0_8 = arith.constant 0 : index
    %15 = vector.load %arg9[%14, %c1, %c0_8] : memref<9x9x16xf32, #tpu.memory_space<vmem>>, vector<8x8x16xf32>
    %16 = vector.shape_cast %15 : vector<8x8x16xf32> to vector<64x16xf32>
    %c1_9 = arith.constant 1 : index
    %c0_10 = arith.constant 0 : index
    %c0_11 = arith.constant 0 : index
    %17 = vector.load %arg3[%c1_9, %c0_10, %c0_11] : memref<4x16x8xf32, #tpu.memory_space<vmem>>, vector<1x16x8xf32>
    %18 = vector.shape_cast %17 : vector<1x16x8xf32> to vector<16x8xf32>
    %cst_12 = arith.constant dense<0.000000e+00> : vector<64x8xf32>
    %19 = tpu.matmul %16, %18, %cst_12 {dimension_numbers = #tpu.dot_dimension_numbers<[1], [0], [0], [1], [0, 0, 1, 1], [], []>} : vector<64x16xf32>, vector<16x8xf32>, vector<64x8xf32> -> vector<64x8xf32>
    %20 = arith.addf %12, %19 : vector<64x8xf32>
    %c1_i32 = arith.constant 1 : i32
    %21 = arith.addi %3, %c1_i32 : i32
    %22 = arith.index_cast %21 : i32 to index
    %c0_13 = arith.constant 0 : index
    %c0_14 = arith.constant 0 : index
    %23 = vector.load %arg9[%22, %c0_13, %c0_14] : memref<9x9x16xf32, #tpu.memory_space<vmem>>, vector<8x8x16xf32>
    %24 = vector.shape_cast %23 : vector<8x8x16xf32> to vector<64x16xf32>
    %c2 = arith.constant 2 : index
    %c0_15 = arith.constant 0 : index
    %c0_16 = arith.constant 0 : index
    %25 = vector.load %arg3[%c2, %c0_15, %c0_16] : memref<4x16x8xf32, #tpu.memory_space<vmem>>, vector<1x16x8xf32>
    %26 = vector.shape_cast %25 : vector<1x16x8xf32> to vector<16x8xf32>
    %cst_17 = arith.constant dense<0.000000e+00> : vector<64x8xf32>
    %27 = tpu.matmul %24, %26, %cst_17 {dimension_numbers = #tpu.dot_dimension_numbers<[1], [0], [0], [1], [0, 0, 1, 1], [], []>} : vector<64x16xf32>, vector<16x8xf32>, vector<64x8xf32> -> vector<64x8xf32>
    %28 = arith.addf %20, %27 : vector<64x8xf32>
    %c1_i32_18 = arith.constant 1 : i32
    %29 = arith.addi %3, %c1_i32_18 : i32
    %30 = arith.index_cast %29 : i32 to index
    %c1_19 = arith.constant 1 : index
    %c0_20 = arith.constant 0 : index
    %31 = vector.load %arg9[%30, %c1_19, %c0_20] : memref<9x9x16xf32, #tpu.memory_space<vmem>>, vector<8x8x16xf32>
    %32 = vector.shape_cast %31 : vector<8x8x16xf32> to vector<64x16xf32>
    %c3 = arith.constant 3 : index
    %c0_21 = arith.constant 0 : index
    %c0_22 = arith.constant 0 : index
    %33 = vector.load %arg3[%c3, %c0_21, %c0_22] : memref<4x16x8xf32, #tpu.memory_space<vmem>>, vector<1x16x8xf32>
    %34 = vector.shape_cast %33 : vector<1x16x8xf32> to vector<16x8xf32>
    %cst_23 = arith.constant dense<0.000000e+00> : vector<64x8xf32>
    %35 = tpu.matmul %32, %34, %cst_23 {dimension_numbers = #tpu.dot_dimension_numbers<[1], [0], [0], [1], [0, 0, 1, 1], [], []>} : vector<64x16xf32>, vector<16x8xf32>, vector<64x8xf32> -> vector<64x8xf32>
    %36 = arith.addf %28, %35 : vector<64x8xf32>
    %37 = vector.shape_cast %36 : vector<64x8xf32> to vector<1x8x8x8xf32>
    %c0_24 = arith.constant 0 : index
    %c0_25 = arith.constant 0 : index
    %c0_26 = arith.constant 0 : index
    %c0_27 = arith.constant 0 : index
    %38 = vector.load %arg7[%c0_24, %c0_25, %c0_26, %c0_27] : memref<1x8x8x8xf32, #tpu.memory_space<vmem>>, vector<1x8x8x8xf32>
    tpu.vector_store %arg7[%c0_24, %c0_25, %c0_26, %c0_27], %37 {strides = array<i32>} : memref<1x8x8x8xf32, #tpu.memory_space<vmem>>, vector<1x8x8x8xf32>,
    %cst_28 = arith.constant dense<0.000000e+00> : vector<8xf32>
    %39 = vector.multi_reduction <add>, %36, %cst_28 [0] : vector<64x8xf32> to vector<8xf32>
    %40 = vector.shape_cast %39 : vector<8xf32> to vector<1x8xf32>
    %41 = arith.mulf %36, %36 : vector<64x8xf32>
    %cst_29 = arith.constant dense<0.000000e+00> : vector<8xf32>
    %42 = vector.multi_reduction <add>, %41, %cst_29 [0] : vector<64x8xf32> to vector<8xf32>
    %43 = vector.shape_cast %42 : vector<8xf32> to vector<1x8xf32>
    %44 = tpu.concatenate %40, %43 in 0 : vector<1x8xf32>, vector<1x8xf32> -> vector<2x8xf32>
    %45 = vector.shape_cast %44 : vector<2x8xf32> to vector<1x1x2x8xf32>
    %c0_30 = arith.constant 0 : index
    %c0_31 = arith.constant 0 : index
    %c0_32 = arith.constant 0 : index
    %c0_33 = arith.constant 0 : index
    %46 = vector.load %arg8[%c0_30, %c0_31, %c0_32, %c0_33] : memref<1x1x2x8xf32, #tpu.memory_space<vmem>>, vector<1x1x2x8xf32>
    tpu.vector_store %arg8[%c0_30, %c0_31, %c0_32, %c0_33], %45 {strides = array<i32>} : memref<1x1x2x8xf32, #tpu.memory_space<vmem>>, vector<1x1x2x8xf32>,
    return
  }
  func.func @transform_0(%arg0: i32, %arg1: i32) -> (i32, i32, i32, i32) {
    %c0_i32 = arith.constant 0 : i32
    %c0_i32_0 = arith.constant 0 : i32
    %c0_i32_1 = arith.constant 0 : i32
    %c0_i32_2 = arith.constant 0 : i32
    return %arg0, %c0_i32, %c0_i32_0, %c0_i32_1 : i32, i32, i32, i32
  }
  func.func @transform_1(%arg0: i32, %arg1: i32) -> (i32, i32, i32) {
    %c0_i32 = arith.constant 0 : i32
    %c0_i32_0 = arith.constant 0 : i32
    %c0_i32_1 = arith.constant 0 : i32
    %c0_i32_2 = arith.constant 0 : i32
    return %c0_i32, %c0_i32_0, %c0_i32_1 : i32, i32, i32
  }
  func.func @transform_2(%arg0: i32, %arg1: i32) -> (i32, i32) {
    %c0_i32 = arith.constant 0 : i32
    %c0_i32_0 = arith.constant 0 : i32
    %c0_i32_1 = arith.constant 0 : i32
    return %c0_i32, %c0_i32_0 : i32, i32
  }
  func.func @transform_3(%arg0: i32, %arg1: i32) -> (i32, i32) {
    %c0_i32 = arith.constant 0 : i32
    %c0_i32_0 = arith.constant 0 : i32
    %c0_i32_1 = arith.constant 0 : i32
    return %c0_i32, %c0_i32_0 : i32, i32
  }
  func.func @transform_4(%arg0: i32, %arg1: i32) -> (i32, i32) {
    %c0_i32 = arith.constant 0 : i32
    %c0_i32_0 = arith.constant 0 : i32
    %c0_i32_1 = arith.constant 0 : i32
    return %c0_i32, %c0_i32_0 : i32, i32
  }
  func.func @transform_5(%arg0: i32, %arg1: i32) -> (i32, i32, i32, i32) {
    %c0_i32 = arith.constant 0 : i32
    %c0_i32_0 = arith.constant 0 : i32
    %c0_i32_1 = arith.constant 0 : i32
    return %arg0, %arg1, %c0_i32, %c0_i32_0 : i32, i32, i32, i32
  }
  func.func @transform_6(%arg0: i32, %arg1: i32) -> (i32, i32, i32, i32) {
    %c0_i32 = arith.constant 0 : i32
    %c0_i32_0 = arith.constant 0 : i32
    %c0_i32_1 = arith.constant 0 : i32
    return %arg0, %arg1, %c0_i32, %c0_i32_0 : i32, i32, i32, i32
  }
}

module attributes {stable_mosaic.version = 11 : i64} {
  func.func @_conv_kernel(%arg0: i32, %arg1: i32, %arg2: memref<1x8x8x8xf32, #tpu.memory_space<vmem>>, %arg3: memref<9x8x8xf32, #tpu.memory_space<vmem>>, %arg4: memref<1x8xf32, #tpu.memory_space<vmem>>, %arg5: memref<1x8xf32, #tpu.memory_space<vmem>>, %arg6: memref<1x8xf32, #tpu.memory_space<vmem>>, %arg7: memref<1x8x8x8xf32, #tpu.memory_space<vmem>>, %arg8: memref<1x1x2x8xf32, #tpu.memory_space<vmem>>, %arg9: memref<10x10x8xf32, #tpu.memory_space<vmem>>) attributes {dimension_semantics = [#tpu.dimension_semantics<parallel>, #tpu.dimension_semantics<arbitrary>], iteration_bounds = array<i64: 2, 1>, scalar_prefetch = 0 : i64, scratch_operands = 1 : i64, tpu.core_type = #tpu.core_type<tc>, window_params = [{transform_indices = @transform_0, window_bounds = array<i64: 1, 8, 8, 8>}, {pipeline_mode = #tpu.pipeline_mode<synchronous>, transform_indices = @transform_1, window_bounds = array<i64: 9, 8, 8>}, {pipeline_mode = #tpu.pipeline_mode<synchronous>, transform_indices = @transform_2, window_bounds = array<i64: 1, 8>}, {pipeline_mode = #tpu.pipeline_mode<synchronous>, transform_indices = @transform_3, window_bounds = array<i64: 1, 8>}, {pipeline_mode = #tpu.pipeline_mode<synchronous>, transform_indices = @transform_4, window_bounds = array<i64: 1, 8>}, {transform_indices = @transform_5, window_bounds = array<i64: 1, 8, 8, 8>}, {transform_indices = @transform_6, window_bounds = array<i64: 1, 1, 2, 8>}]} {
    %c0_i32 = arith.constant 0 : i32
    %0 = arith.cmpi eq, %arg1, %c0_i32 : i32
    %1 = arith.extui %0 : i1 to i32
    %c0_i32_0 = arith.constant 0 : i32
    %2 = arith.cmpi ne, %1, %c0_i32_0 : i32
    scf.if %2 {
      %c0_63 = arith.constant 0 : index
      %c0_64 = arith.constant 0 : index
      %c0_65 = arith.constant 0 : index
      %c0_66 = arith.constant 0 : index
      %87 = vector.load %arg2[%c0_63, %c0_64, %c0_65, %c0_66] : memref<1x8x8x8xf32, #tpu.memory_space<vmem>>, vector<1x8x8x8xf32>
      %88 = vector.shape_cast %87 : vector<1x8x8x8xf32> to vector<8x8x8xf32>
      %c0_67 = arith.constant 0 : index
      %c0_68 = arith.constant 0 : index
      %89 = vector.load %arg4[%c0_67, %c0_68] : memref<1x8xf32, #tpu.memory_space<vmem>>, vector<1x8xf32>
      %90 = vector.shape_cast %89 : vector<1x8xf32> to vector<1x1x8xf32>
      %91 = vector.broadcast %90 : vector<1x1x8xf32> to vector<8x8x8xf32>
      %92 = arith.mulf %88, %91 : vector<8x8x8xf32>
      %c0_69 = arith.constant 0 : index
      %c0_70 = arith.constant 0 : index
      %93 = vector.load %arg5[%c0_69, %c0_70] : memref<1x8xf32, #tpu.memory_space<vmem>>, vector<1x8xf32>
      %94 = vector.shape_cast %93 : vector<1x8xf32> to vector<1x1x8xf32>
      %95 = vector.broadcast %94 : vector<1x1x8xf32> to vector<8x8x8xf32>
      %96 = arith.addf %92, %95 : vector<8x8x8xf32>
      %cst_71 = arith.constant 0.000000e+00 : f32
      %97 = vector.broadcast %cst_71 : f32 to vector<8x8x8xf32>
      %98 = arith.maximumf %96, %97 : vector<8x8x8xf32>
      %cst_72 = arith.constant 0.000000e+00 : f32
      %99 = vector.broadcast %cst_72 : f32 to vector<10x10x8xf32>
      %c0_73 = arith.constant 0 : index
      %c0_74 = arith.constant 0 : index
      %c0_75 = arith.constant 0 : index
      %100 = vector.load %arg9[%c0_73, %c0_74, %c0_75] : memref<10x10x8xf32, #tpu.memory_space<vmem>>, vector<10x10x8xf32>
      tpu.vector_store %arg9[%c0_73, %c0_74, %c0_75], %99 {strides = array<i32>} : memref<10x10x8xf32, #tpu.memory_space<vmem>>, vector<10x10x8xf32>,
      %c1_76 = arith.constant 1 : index
      %c1_77 = arith.constant 1 : index
      %c0_78 = arith.constant 0 : index
      %101 = vector.load %arg9[%c1_76, %c1_77, %c0_78] : memref<10x10x8xf32, #tpu.memory_space<vmem>>, vector<8x8x8xf32>
      tpu.vector_store %arg9[%c1_76, %c1_77, %c0_78], %98 {strides = array<i32>} : memref<10x10x8xf32, #tpu.memory_space<vmem>>, vector<8x8x8xf32>,
    } else {
    }
    %c8_i32 = arith.constant 8 : i32
    %3 = arith.muli %arg1, %c8_i32 : i32
    %cst = arith.constant 0.000000e+00 : f32
    %4 = vector.broadcast %cst : f32 to vector<64x8xf32>
    %c0_i32_1 = arith.constant 0 : i32
    %5 = arith.addi %3, %c0_i32_1 : i32
    %6 = arith.index_cast %5 : i32 to index
    %c0 = arith.constant 0 : index
    %c0_2 = arith.constant 0 : index
    %7 = vector.load %arg9[%6, %c0, %c0_2] : memref<10x10x8xf32, #tpu.memory_space<vmem>>, vector<8x8x8xf32>
    %8 = vector.shape_cast %7 : vector<8x8x8xf32> to vector<64x8xf32>
    %c0_3 = arith.constant 0 : index
    %c0_4 = arith.constant 0 : index
    %c0_5 = arith.constant 0 : index
    %9 = vector.load %arg3[%c0_3, %c0_4, %c0_5] : memref<9x8x8xf32, #tpu.memory_space<vmem>>, vector<1x8x8xf32>
    %10 = vector.shape_cast %9 : vector<1x8x8xf32> to vector<8x8xf32>
    %cst_6 = arith.constant dense<0.000000e+00> : vector<64x8xf32>
    %11 = tpu.matmul %8, %10, %cst_6 {dimension_numbers = #tpu.dot_dimension_numbers<[1], [0], [0], [1], [0, 0, 1, 1], [], []>} : vector<64x8xf32>, vector<8x8xf32>, vector<64x8xf32> -> vector<64x8xf32>
    %12 = arith.addf %4, %11 : vector<64x8xf32>
    %c0_i32_7 = arith.constant 0 : i32
    %13 = arith.addi %3, %c0_i32_7 : i32
    %14 = arith.index_cast %13 : i32 to index
    %c1 = arith.constant 1 : index
    %c0_8 = arith.constant 0 : index
    %15 = vector.load %arg9[%14, %c1, %c0_8] : memref<10x10x8xf32, #tpu.memory_space<vmem>>, vector<8x8x8xf32>
    %16 = vector.shape_cast %15 : vector<8x8x8xf32> to vector<64x8xf32>
    %c1_9 = arith.constant 1 : index
    %c0_10 = arith.constant 0 : index
    %c0_11 = arith.constant 0 : index
    %17 = vector.load %arg3[%c1_9, %c0_10, %c0_11] : memref<9x8x8xf32, #tpu.memory_space<vmem>>, vector<1x8x8xf32>
    %18 = vector.shape_cast %17 : vector<1x8x8xf32> to vector<8x8xf32>
    %cst_12 = arith.constant dense<0.000000e+00> : vector<64x8xf32>
    %19 = tpu.matmul %16, %18, %cst_12 {dimension_numbers = #tpu.dot_dimension_numbers<[1], [0], [0], [1], [0, 0, 1, 1], [], []>} : vector<64x8xf32>, vector<8x8xf32>, vector<64x8xf32> -> vector<64x8xf32>
    %20 = arith.addf %12, %19 : vector<64x8xf32>
    %c0_i32_13 = arith.constant 0 : i32
    %21 = arith.addi %3, %c0_i32_13 : i32
    %22 = arith.index_cast %21 : i32 to index
    %c2 = arith.constant 2 : index
    %c0_14 = arith.constant 0 : index
    %23 = vector.load %arg9[%22, %c2, %c0_14] : memref<10x10x8xf32, #tpu.memory_space<vmem>>, vector<8x8x8xf32>
    %24 = vector.shape_cast %23 : vector<8x8x8xf32> to vector<64x8xf32>
    %c2_15 = arith.constant 2 : index
    %c0_16 = arith.constant 0 : index
    %c0_17 = arith.constant 0 : index
    %25 = vector.load %arg3[%c2_15, %c0_16, %c0_17] : memref<9x8x8xf32, #tpu.memory_space<vmem>>, vector<1x8x8xf32>
    %26 = vector.shape_cast %25 : vector<1x8x8xf32> to vector<8x8xf32>
    %cst_18 = arith.constant dense<0.000000e+00> : vector<64x8xf32>
    %27 = tpu.matmul %24, %26, %cst_18 {dimension_numbers = #tpu.dot_dimension_numbers<[1], [0], [0], [1], [0, 0, 1, 1], [], []>} : vector<64x8xf32>, vector<8x8xf32>, vector<64x8xf32> -> vector<64x8xf32>
    %28 = arith.addf %20, %27 : vector<64x8xf32>
    %c1_i32 = arith.constant 1 : i32
    %29 = arith.addi %3, %c1_i32 : i32
    %30 = arith.index_cast %29 : i32 to index
    %c0_19 = arith.constant 0 : index
    %c0_20 = arith.constant 0 : index
    %31 = vector.load %arg9[%30, %c0_19, %c0_20] : memref<10x10x8xf32, #tpu.memory_space<vmem>>, vector<8x8x8xf32>
    %32 = vector.shape_cast %31 : vector<8x8x8xf32> to vector<64x8xf32>
    %c3 = arith.constant 3 : index
    %c0_21 = arith.constant 0 : index
    %c0_22 = arith.constant 0 : index
    %33 = vector.load %arg3[%c3, %c0_21, %c0_22] : memref<9x8x8xf32, #tpu.memory_space<vmem>>, vector<1x8x8xf32>
    %34 = vector.shape_cast %33 : vector<1x8x8xf32> to vector<8x8xf32>
    %cst_23 = arith.constant dense<0.000000e+00> : vector<64x8xf32>
    %35 = tpu.matmul %32, %34, %cst_23 {dimension_numbers = #tpu.dot_dimension_numbers<[1], [0], [0], [1], [0, 0, 1, 1], [], []>} : vector<64x8xf32>, vector<8x8xf32>, vector<64x8xf32> -> vector<64x8xf32>
    %36 = arith.addf %28, %35 : vector<64x8xf32>
    %c1_i32_24 = arith.constant 1 : i32
    %37 = arith.addi %3, %c1_i32_24 : i32
    %38 = arith.index_cast %37 : i32 to index
    %c1_25 = arith.constant 1 : index
    %c0_26 = arith.constant 0 : index
    %39 = vector.load %arg9[%38, %c1_25, %c0_26] : memref<10x10x8xf32, #tpu.memory_space<vmem>>, vector<8x8x8xf32>
    %40 = vector.shape_cast %39 : vector<8x8x8xf32> to vector<64x8xf32>
    %c4 = arith.constant 4 : index
    %c0_27 = arith.constant 0 : index
    %c0_28 = arith.constant 0 : index
    %41 = vector.load %arg3[%c4, %c0_27, %c0_28] : memref<9x8x8xf32, #tpu.memory_space<vmem>>, vector<1x8x8xf32>
    %42 = vector.shape_cast %41 : vector<1x8x8xf32> to vector<8x8xf32>
    %cst_29 = arith.constant dense<0.000000e+00> : vector<64x8xf32>
    %43 = tpu.matmul %40, %42, %cst_29 {dimension_numbers = #tpu.dot_dimension_numbers<[1], [0], [0], [1], [0, 0, 1, 1], [], []>} : vector<64x8xf32>, vector<8x8xf32>, vector<64x8xf32> -> vector<64x8xf32>
    %44 = arith.addf %36, %43 : vector<64x8xf32>
    %c1_i32_30 = arith.constant 1 : i32
    %45 = arith.addi %3, %c1_i32_30 : i32
    %46 = arith.index_cast %45 : i32 to index
    %c2_31 = arith.constant 2 : index
    %c0_32 = arith.constant 0 : index
    %47 = vector.load %arg9[%46, %c2_31, %c0_32] : memref<10x10x8xf32, #tpu.memory_space<vmem>>, vector<8x8x8xf32>
    %48 = vector.shape_cast %47 : vector<8x8x8xf32> to vector<64x8xf32>
    %c5 = arith.constant 5 : index
    %c0_33 = arith.constant 0 : index
    %c0_34 = arith.constant 0 : index
    %49 = vector.load %arg3[%c5, %c0_33, %c0_34] : memref<9x8x8xf32, #tpu.memory_space<vmem>>, vector<1x8x8xf32>
    %50 = vector.shape_cast %49 : vector<1x8x8xf32> to vector<8x8xf32>
    %cst_35 = arith.constant dense<0.000000e+00> : vector<64x8xf32>
    %51 = tpu.matmul %48, %50, %cst_35 {dimension_numbers = #tpu.dot_dimension_numbers<[1], [0], [0], [1], [0, 0, 1, 1], [], []>} : vector<64x8xf32>, vector<8x8xf32>, vector<64x8xf32> -> vector<64x8xf32>
    %52 = arith.addf %44, %51 : vector<64x8xf32>
    %c2_i32 = arith.constant 2 : i32
    %53 = arith.addi %3, %c2_i32 : i32
    %54 = arith.index_cast %53 : i32 to index
    %c0_36 = arith.constant 0 : index
    %c0_37 = arith.constant 0 : index
    %55 = vector.load %arg9[%54, %c0_36, %c0_37] : memref<10x10x8xf32, #tpu.memory_space<vmem>>, vector<8x8x8xf32>
    %56 = vector.shape_cast %55 : vector<8x8x8xf32> to vector<64x8xf32>
    %c6 = arith.constant 6 : index
    %c0_38 = arith.constant 0 : index
    %c0_39 = arith.constant 0 : index
    %57 = vector.load %arg3[%c6, %c0_38, %c0_39] : memref<9x8x8xf32, #tpu.memory_space<vmem>>, vector<1x8x8xf32>
    %58 = vector.shape_cast %57 : vector<1x8x8xf32> to vector<8x8xf32>
    %cst_40 = arith.constant dense<0.000000e+00> : vector<64x8xf32>
    %59 = tpu.matmul %56, %58, %cst_40 {dimension_numbers = #tpu.dot_dimension_numbers<[1], [0], [0], [1], [0, 0, 1, 1], [], []>} : vector<64x8xf32>, vector<8x8xf32>, vector<64x8xf32> -> vector<64x8xf32>
    %60 = arith.addf %52, %59 : vector<64x8xf32>
    %c2_i32_41 = arith.constant 2 : i32
    %61 = arith.addi %3, %c2_i32_41 : i32
    %62 = arith.index_cast %61 : i32 to index
    %c1_42 = arith.constant 1 : index
    %c0_43 = arith.constant 0 : index
    %63 = vector.load %arg9[%62, %c1_42, %c0_43] : memref<10x10x8xf32, #tpu.memory_space<vmem>>, vector<8x8x8xf32>
    %64 = vector.shape_cast %63 : vector<8x8x8xf32> to vector<64x8xf32>
    %c7 = arith.constant 7 : index
    %c0_44 = arith.constant 0 : index
    %c0_45 = arith.constant 0 : index
    %65 = vector.load %arg3[%c7, %c0_44, %c0_45] : memref<9x8x8xf32, #tpu.memory_space<vmem>>, vector<1x8x8xf32>
    %66 = vector.shape_cast %65 : vector<1x8x8xf32> to vector<8x8xf32>
    %cst_46 = arith.constant dense<0.000000e+00> : vector<64x8xf32>
    %67 = tpu.matmul %64, %66, %cst_46 {dimension_numbers = #tpu.dot_dimension_numbers<[1], [0], [0], [1], [0, 0, 1, 1], [], []>} : vector<64x8xf32>, vector<8x8xf32>, vector<64x8xf32> -> vector<64x8xf32>
    %68 = arith.addf %60, %67 : vector<64x8xf32>
    %c2_i32_47 = arith.constant 2 : i32
    %69 = arith.addi %3, %c2_i32_47 : i32
    %70 = arith.index_cast %69 : i32 to index
    %c2_48 = arith.constant 2 : index
    %c0_49 = arith.constant 0 : index
    %71 = vector.load %arg9[%70, %c2_48, %c0_49] : memref<10x10x8xf32, #tpu.memory_space<vmem>>, vector<8x8x8xf32>
    %72 = vector.shape_cast %71 : vector<8x8x8xf32> to vector<64x8xf32>
    %c8 = arith.constant 8 : index
    %c0_50 = arith.constant 0 : index
    %c0_51 = arith.constant 0 : index
    %73 = vector.load %arg3[%c8, %c0_50, %c0_51] : memref<9x8x8xf32, #tpu.memory_space<vmem>>, vector<1x8x8xf32>
    %74 = vector.shape_cast %73 : vector<1x8x8xf32> to vector<8x8xf32>
    %cst_52 = arith.constant dense<0.000000e+00> : vector<64x8xf32>
    %75 = tpu.matmul %72, %74, %cst_52 {dimension_numbers = #tpu.dot_dimension_numbers<[1], [0], [0], [1], [0, 0, 1, 1], [], []>} : vector<64x8xf32>, vector<8x8xf32>, vector<64x8xf32> -> vector<64x8xf32>
    %76 = arith.addf %68, %75 : vector<64x8xf32>
    %77 = vector.shape_cast %76 : vector<64x8xf32> to vector<1x8x8x8xf32>
    %c0_53 = arith.constant 0 : index
    %c0_54 = arith.constant 0 : index
    %c0_55 = arith.constant 0 : index
    %c0_56 = arith.constant 0 : index
    %78 = vector.load %arg7[%c0_53, %c0_54, %c0_55, %c0_56] : memref<1x8x8x8xf32, #tpu.memory_space<vmem>>, vector<1x8x8x8xf32>
    tpu.vector_store %arg7[%c0_53, %c0_54, %c0_55, %c0_56], %77 {strides = array<i32>} : memref<1x8x8x8xf32, #tpu.memory_space<vmem>>, vector<1x8x8x8xf32>,
    %cst_57 = arith.constant dense<0.000000e+00> : vector<8xf32>
    %79 = vector.multi_reduction <add>, %76, %cst_57 [0] : vector<64x8xf32> to vector<8xf32>
    %80 = vector.shape_cast %79 : vector<8xf32> to vector<1x8xf32>
    %81 = arith.mulf %76, %76 : vector<64x8xf32>
    %cst_58 = arith.constant dense<0.000000e+00> : vector<8xf32>
    %82 = vector.multi_reduction <add>, %81, %cst_58 [0] : vector<64x8xf32> to vector<8xf32>
    %83 = vector.shape_cast %82 : vector<8xf32> to vector<1x8xf32>
    %84 = tpu.concatenate %80, %83 in 0 : vector<1x8xf32>, vector<1x8xf32> -> vector<2x8xf32>
    %85 = vector.shape_cast %84 : vector<2x8xf32> to vector<1x1x2x8xf32>
    %c0_59 = arith.constant 0 : index
    %c0_60 = arith.constant 0 : index
    %c0_61 = arith.constant 0 : index
    %c0_62 = arith.constant 0 : index
    %86 = vector.load %arg8[%c0_59, %c0_60, %c0_61, %c0_62] : memref<1x1x2x8xf32, #tpu.memory_space<vmem>>, vector<1x1x2x8xf32>
    tpu.vector_store %arg8[%c0_59, %c0_60, %c0_61, %c0_62], %85 {strides = array<i32>} : memref<1x1x2x8xf32, #tpu.memory_space<vmem>>, vector<1x1x2x8xf32>,
    return
  }
  func.func @transform_0(%arg0: i32, %arg1: i32) -> (i32, i32, i32, i32) {
    %c0_i32 = arith.constant 0 : i32
    %c0_i32_0 = arith.constant 0 : i32
    %c0_i32_1 = arith.constant 0 : i32
    %c0_i32_2 = arith.constant 0 : i32
    return %arg0, %c0_i32, %c0_i32_0, %c0_i32_1 : i32, i32, i32, i32
  }
  func.func @transform_1(%arg0: i32, %arg1: i32) -> (i32, i32, i32) {
    %c0_i32 = arith.constant 0 : i32
    %c0_i32_0 = arith.constant 0 : i32
    %c0_i32_1 = arith.constant 0 : i32
    %c0_i32_2 = arith.constant 0 : i32
    return %c0_i32, %c0_i32_0, %c0_i32_1 : i32, i32, i32
  }
  func.func @transform_2(%arg0: i32, %arg1: i32) -> (i32, i32) {
    %c0_i32 = arith.constant 0 : i32
    %c0_i32_0 = arith.constant 0 : i32
    %c0_i32_1 = arith.constant 0 : i32
    return %c0_i32, %c0_i32_0 : i32, i32
  }
  func.func @transform_3(%arg0: i32, %arg1: i32) -> (i32, i32) {
    %c0_i32 = arith.constant 0 : i32
    %c0_i32_0 = arith.constant 0 : i32
    %c0_i32_1 = arith.constant 0 : i32
    return %c0_i32, %c0_i32_0 : i32, i32
  }
  func.func @transform_4(%arg0: i32, %arg1: i32) -> (i32, i32) {
    %c0_i32 = arith.constant 0 : i32
    %c0_i32_0 = arith.constant 0 : i32
    %c0_i32_1 = arith.constant 0 : i32
    return %c0_i32, %c0_i32_0 : i32, i32
  }
  func.func @transform_5(%arg0: i32, %arg1: i32) -> (i32, i32, i32, i32) {
    %c0_i32 = arith.constant 0 : i32
    %c0_i32_0 = arith.constant 0 : i32
    %c0_i32_1 = arith.constant 0 : i32
    return %arg0, %arg1, %c0_i32, %c0_i32_0 : i32, i32, i32, i32
  }
  func.func @transform_6(%arg0: i32, %arg1: i32) -> (i32, i32, i32, i32) {
    %c0_i32 = arith.constant 0 : i32
    %c0_i32_0 = arith.constant 0 : i32
    %c0_i32_1 = arith.constant 0 : i32
    return %arg0, %arg1, %c0_i32, %c0_i32_0 : i32, i32, i32, i32
  }
}

module attributes {stable_mosaic.version = 11 : i64} {
  func.func @_bn_res_leaky_kernel(%arg0: i32, %arg1: memref<8x128xf32, #tpu.memory_space<vmem>>, %arg2: memref<8x128xf32, #tpu.memory_space<vmem>>, %arg3: memref<1x128xf32, #tpu.memory_space<vmem>>, %arg4: memref<1x128xf32, #tpu.memory_space<vmem>>, %arg5: memref<8x128xf32, #tpu.memory_space<vmem>>) attributes {dimension_semantics = [#tpu.dimension_semantics<parallel>], iteration_bounds = array<i64: 1>, scalar_prefetch = 0 : i64, scratch_operands = 0 : i64, tpu.core_type = #tpu.core_type<tc>, window_params = [{transform_indices = @transform_0, window_bounds = array<i64: 8, 128>}, {transform_indices = @transform_1, window_bounds = array<i64: 8, 128>}, {pipeline_mode = #tpu.pipeline_mode<synchronous>, transform_indices = @transform_2, window_bounds = array<i64: 1, 128>}, {pipeline_mode = #tpu.pipeline_mode<synchronous>, transform_indices = @transform_3, window_bounds = array<i64: 1, 128>}, {transform_indices = @transform_4, window_bounds = array<i64: 8, 128>}]} {
    %c0 = arith.constant 0 : index
    %c0_0 = arith.constant 0 : index
    %0 = vector.load %arg1[%c0, %c0_0] : memref<8x128xf32, #tpu.memory_space<vmem>>, vector<8x128xf32>
    %c0_1 = arith.constant 0 : index
    %c0_2 = arith.constant 0 : index
    %1 = vector.load %arg3[%c0_1, %c0_2] : memref<1x128xf32, #tpu.memory_space<vmem>>, vector<1x128xf32>
    %2 = vector.broadcast %1 : vector<1x128xf32> to vector<8x128xf32>
    %3 = arith.mulf %0, %2 : vector<8x128xf32>
    %c0_3 = arith.constant 0 : index
    %c0_4 = arith.constant 0 : index
    %4 = vector.load %arg4[%c0_3, %c0_4] : memref<1x128xf32, #tpu.memory_space<vmem>>, vector<1x128xf32>
    %5 = vector.broadcast %4 : vector<1x128xf32> to vector<8x128xf32>
    %6 = arith.addf %3, %5 : vector<8x128xf32>
    %c0_5 = arith.constant 0 : index
    %c0_6 = arith.constant 0 : index
    %7 = vector.load %arg2[%c0_5, %c0_6] : memref<8x128xf32, #tpu.memory_space<vmem>>, vector<8x128xf32>
    %8 = arith.addf %6, %7 : vector<8x128xf32>
    %cst = arith.constant 0.000000e+00 : f32
    %9 = vector.broadcast %cst : f32 to vector<8x128xf32>
    %10 = arith.cmpf ogt, %8, %9 : vector<8x128xf32>
    %cst_7 = arith.constant 0.00999999977 : f32
    %11 = vector.broadcast %cst_7 : f32 to vector<8x128xf32>
    %12 = arith.mulf %11, %8 : vector<8x128xf32>
    %13 = arith.select %10, %8, %12 : vector<8x128xi1>, vector<8x128xf32>
    %c0_8 = arith.constant 0 : index
    %c0_9 = arith.constant 0 : index
    %14 = vector.load %arg5[%c0_8, %c0_9] : memref<8x128xf32, #tpu.memory_space<vmem>>, vector<8x128xf32>
    tpu.vector_store %arg5[%c0_8, %c0_9], %13 {strides = array<i32>} : memref<8x128xf32, #tpu.memory_space<vmem>>, vector<8x128xf32>,
    return
  }
  func.func @transform_0(%arg0: i32) -> (i32, i32) {
    %c0_i32 = arith.constant 0 : i32
    %c0_i32_0 = arith.constant 0 : i32
    return %arg0, %c0_i32 : i32, i32
  }
  func.func @transform_1(%arg0: i32) -> (i32, i32) {
    %c0_i32 = arith.constant 0 : i32
    %c0_i32_0 = arith.constant 0 : i32
    return %arg0, %c0_i32 : i32, i32
  }
  func.func @transform_2(%arg0: i32) -> (i32, i32) {
    %c0_i32 = arith.constant 0 : i32
    %c0_i32_0 = arith.constant 0 : i32
    %c0_i32_1 = arith.constant 0 : i32
    return %c0_i32, %c0_i32_0 : i32, i32
  }
  func.func @transform_3(%arg0: i32) -> (i32, i32) {
    %c0_i32 = arith.constant 0 : i32
    %c0_i32_0 = arith.constant 0 : i32
    %c0_i32_1 = arith.constant 0 : i32
    return %c0_i32, %c0_i32_0 : i32, i32
  }
  func.func @transform_4(%arg0: i32) -> (i32, i32) {
    %c0_i32 = arith.constant 0 : i32
    %c0_i32_0 = arith.constant 0 : i32
    return %arg0, %c0_i32 : i32, i32
  }
}

module attributes {stable_mosaic.version = 11 : i64} {
  func.func @_conv_kernel(%arg0: i32, %arg1: i32, %arg2: memref<1x8x8x16xf32, #tpu.memory_space<vmem>>, %arg3: memref<1x16x8xf32, #tpu.memory_space<vmem>>, %arg4: memref<1x16xf32, #tpu.memory_space<vmem>>, %arg5: memref<1x16xf32, #tpu.memory_space<vmem>>, %arg6: memref<1x8xf32, #tpu.memory_space<vmem>>, %arg7: memref<1x8x8x8xf32, #tpu.memory_space<vmem>>, %arg8: memref<1x1x2x8xf32, #tpu.memory_space<vmem>>, %arg9: memref<8x8x16xf32, #tpu.memory_space<vmem>>) attributes {dimension_semantics = [#tpu.dimension_semantics<parallel>, #tpu.dimension_semantics<arbitrary>], iteration_bounds = array<i64: 2, 1>, scalar_prefetch = 0 : i64, scratch_operands = 1 : i64, tpu.core_type = #tpu.core_type<tc>, window_params = [{transform_indices = @transform_0, window_bounds = array<i64: 1, 8, 8, 16>}, {pipeline_mode = #tpu.pipeline_mode<synchronous>, transform_indices = @transform_1, window_bounds = array<i64: 1, 16, 8>}, {pipeline_mode = #tpu.pipeline_mode<synchronous>, transform_indices = @transform_2, window_bounds = array<i64: 1, 16>}, {pipeline_mode = #tpu.pipeline_mode<synchronous>, transform_indices = @transform_3, window_bounds = array<i64: 1, 16>}, {pipeline_mode = #tpu.pipeline_mode<synchronous>, transform_indices = @transform_4, window_bounds = array<i64: 1, 8>}, {transform_indices = @transform_5, window_bounds = array<i64: 1, 8, 8, 8>}, {transform_indices = @transform_6, window_bounds = array<i64: 1, 1, 2, 8>}]} {
    %c0_i32 = arith.constant 0 : i32
    %0 = arith.cmpi eq, %arg1, %c0_i32 : i32
    %1 = arith.extui %0 : i1 to i32
    %c0_i32_0 = arith.constant 0 : i32
    %2 = arith.cmpi ne, %1, %c0_i32_0 : i32
    scf.if %2 {
      %c0_19 = arith.constant 0 : index
      %c0_20 = arith.constant 0 : index
      %c0_21 = arith.constant 0 : index
      %c0_22 = arith.constant 0 : index
      %26 = vector.load %arg2[%c0_19, %c0_20, %c0_21, %c0_22] : memref<1x8x8x16xf32, #tpu.memory_space<vmem>>, vector<1x8x8x16xf32>
      %27 = vector.shape_cast %26 : vector<1x8x8x16xf32> to vector<8x8x16xf32>
      %c0_23 = arith.constant 0 : index
      %c0_24 = arith.constant 0 : index
      %c0_25 = arith.constant 0 : index
      %28 = vector.load %arg9[%c0_23, %c0_24, %c0_25] : memref<8x8x16xf32, #tpu.memory_space<vmem>>, vector<8x8x16xf32>
      tpu.vector_store %arg9[%c0_23, %c0_24, %c0_25], %27 {strides = array<i32>} : memref<8x8x16xf32, #tpu.memory_space<vmem>>, vector<8x8x16xf32>,
    } else {
    }
    %c8_i32 = arith.constant 8 : i32
    %3 = arith.muli %arg1, %c8_i32 : i32
    %cst = arith.constant 0.000000e+00 : f32
    %4 = vector.broadcast %cst : f32 to vector<64x8xf32>
    %c0_i32_1 = arith.constant 0 : i32
    %5 = arith.addi %3, %c0_i32_1 : i32
    %6 = arith.index_cast %5 : i32 to index
    %c0 = arith.constant 0 : index
    %c0_2 = arith.constant 0 : index
    %7 = vector.load %arg9[%6, %c0, %c0_2] : memref<8x8x16xf32, #tpu.memory_space<vmem>>, vector<8x8x16xf32>
    %8 = vector.shape_cast %7 : vector<8x8x16xf32> to vector<64x16xf32>
    %c0_3 = arith.constant 0 : index
    %c0_4 = arith.constant 0 : index
    %c0_5 = arith.constant 0 : index
    %9 = vector.load %arg3[%c0_3, %c0_4, %c0_5] : memref<1x16x8xf32, #tpu.memory_space<vmem>>, vector<1x16x8xf32>
    %10 = vector.shape_cast %9 : vector<1x16x8xf32> to vector<16x8xf32>
    %cst_6 = arith.constant dense<0.000000e+00> : vector<64x8xf32>
    %11 = tpu.matmul %8, %10, %cst_6 {dimension_numbers = #tpu.dot_dimension_numbers<[1], [0], [0], [1], [0, 0, 1, 1], [], []>} : vector<64x16xf32>, vector<16x8xf32>, vector<64x8xf32> -> vector<64x8xf32>
    %12 = arith.addf %4, %11 : vector<64x8xf32>
    %c0_7 = arith.constant 0 : index
    %c0_8 = arith.constant 0 : index
    %13 = vector.load %arg6[%c0_7, %c0_8] : memref<1x8xf32, #tpu.memory_space<vmem>>, vector<1x8xf32>
    %14 = vector.broadcast %13 : vector<1x8xf32> to vector<64x8xf32>
    %15 = arith.addf %12, %14 : vector<64x8xf32>
    %16 = vector.shape_cast %15 : vector<64x8xf32> to vector<1x8x8x8xf32>
    %c0_9 = arith.constant 0 : index
    %c0_10 = arith.constant 0 : index
    %c0_11 = arith.constant 0 : index
    %c0_12 = arith.constant 0 : index
    %17 = vector.load %arg7[%c0_9, %c0_10, %c0_11, %c0_12] : memref<1x8x8x8xf32, #tpu.memory_space<vmem>>, vector<1x8x8x8xf32>
    tpu.vector_store %arg7[%c0_9, %c0_10, %c0_11, %c0_12], %16 {strides = array<i32>} : memref<1x8x8x8xf32, #tpu.memory_space<vmem>>, vector<1x8x8x8xf32>,
    %cst_13 = arith.constant dense<0.000000e+00> : vector<8xf32>
    %18 = vector.multi_reduction <add>, %15, %cst_13 [0] : vector<64x8xf32> to vector<8xf32>
    %19 = vector.shape_cast %18 : vector<8xf32> to vector<1x8xf32>
    %20 = arith.mulf %15, %15 : vector<64x8xf32>
    %cst_14 = arith.constant dense<0.000000e+00> : vector<8xf32>
    %21 = vector.multi_reduction <add>, %20, %cst_14 [0] : vector<64x8xf32> to vector<8xf32>
    %22 = vector.shape_cast %21 : vector<8xf32> to vector<1x8xf32>
    %23 = tpu.concatenate %19, %22 in 0 : vector<1x8xf32>, vector<1x8xf32> -> vector<2x8xf32>
    %24 = vector.shape_cast %23 : vector<2x8xf32> to vector<1x1x2x8xf32>
    %c0_15 = arith.constant 0 : index
    %c0_16 = arith.constant 0 : index
    %c0_17 = arith.constant 0 : index
    %c0_18 = arith.constant 0 : index
    %25 = vector.load %arg8[%c0_15, %c0_16, %c0_17, %c0_18] : memref<1x1x2x8xf32, #tpu.memory_space<vmem>>, vector<1x1x2x8xf32>
    tpu.vector_store %arg8[%c0_15, %c0_16, %c0_17, %c0_18], %24 {strides = array<i32>} : memref<1x1x2x8xf32, #tpu.memory_space<vmem>>, vector<1x1x2x8xf32>,
    return
  }
  func.func @transform_0(%arg0: i32, %arg1: i32) -> (i32, i32, i32, i32) {
    %c0_i32 = arith.constant 0 : i32
    %c0_i32_0 = arith.constant 0 : i32
    %c0_i32_1 = arith.constant 0 : i32
    %c0_i32_2 = arith.constant 0 : i32
    return %arg0, %c0_i32, %c0_i32_0, %c0_i32_1 : i32, i32, i32, i32
  }
  func.func @transform_1(%arg0: i32, %arg1: i32) -> (i32, i32, i32) {
    %c0_i32 = arith.constant 0 : i32
    %c0_i32_0 = arith.constant 0 : i32
    %c0_i32_1 = arith.constant 0 : i32
    %c0_i32_2 = arith.constant 0 : i32
    return %c0_i32, %c0_i32_0, %c0_i32_1 : i32, i32, i32
  }
  func.func @transform_2(%arg0: i32, %arg1: i32) -> (i32, i32) {
    %c0_i32 = arith.constant 0 : i32
    %c0_i32_0 = arith.constant 0 : i32
    %c0_i32_1 = arith.constant 0 : i32
    return %c0_i32, %c0_i32_0 : i32, i32
  }
  func.func @transform_3(%arg0: i32, %arg1: i32) -> (i32, i32) {
    %c0_i32 = arith.constant 0 : i32
    %c0_i32_0 = arith.constant 0 : i32
    %c0_i32_1 = arith.constant 0 : i32
    return %c0_i32, %c0_i32_0 : i32, i32
  }
  func.func @transform_4(%arg0: i32, %arg1: i32) -> (i32, i32) {
    %c0_i32 = arith.constant 0 : i32
    %c0_i32_0 = arith.constant 0 : i32
    %c0_i32_1 = arith.constant 0 : i32
    return %c0_i32, %c0_i32_0 : i32, i32
  }
  func.func @transform_5(%arg0: i32, %arg1: i32) -> (i32, i32, i32, i32) {
    %c0_i32 = arith.constant 0 : i32
    %c0_i32_0 = arith.constant 0 : i32
    %c0_i32_1 = arith.constant 0 : i32
    return %arg0, %arg1, %c0_i32, %c0_i32_0 : i32, i32, i32, i32
  }
  func.func @transform_6(%arg0: i32, %arg1: i32) -> (i32, i32, i32, i32) {
    %c0_i32 = arith.constant 0 : i32
    %c0_i32_0 = arith.constant 0 : i32
    %c0_i32_1 = arith.constant 0 : i32
    return %arg0, %arg1, %c0_i32, %c0_i32_0 : i32, i32, i32, i32
  }
}

</mosaic_0001>

<bundles_post_ra>
// kernel: tile.13
= control target key start
LH: loop header
LB: loop body
LE: loop exit
PB: predicated region body
PF: predicated region fallthrough
CT: control target
= control target key end

     0   :  { %s28_s0 = inlined_call_operand.vmem [shape: f32[8], index: 0, kind: input, shape index: {}]   ;;  %s29_s1 = inlined_call_operand.vmem [shape: f32[16,8], index: 1, kind: output, shape index: {}]  }
   0x1   :  { %v4_v0 = vld [vmem:[%s28_s0] ss:$0 sm:$0xff] }
   0x2   :  { %5 = vst [vmem:[%s29_s1] sm:$0xff] %v4_v0  ;;  %8 = vst [vmem:[%s29_s1 + $0x8] sm:$0xff] %v4_v0 }

// kernel: tile.14
= control target key start
LH: loop header
LB: loop body
LE: loop exit
PB: predicated region body
PF: predicated region fallthrough
CT: control target
= control target key end

     0   :  { %s131_s10 = smov 120   ;;  %s132_s11 = smov 104   ;;  %vm3_vm0 = vcmask 64512   ;;  %vm9_vm1 = vcmask 1048512   ;;  %vm15_vm2 = vcmask 982912   ;;  %vm21_vm3 = vcmask 917312   ;;  %s207_s0 = inlined_call_operand.vmem [shape: f32[16,8], index: 0, kind: input, shape index: {}]   ;;  %s208_s1 = inlined_call_operand.vmem [shape: f32[1,128], index: 1, kind: output, shape index: {}]  }
   0x1   :  { %v101_v0 = vld [vmem:[%s207_s0 + $0xf] sm:$0x1]   ;;  %v103_v1 = vld [vmem:[%s207_s0 + $0xd] sm:$0x1]   ;;  %v102_v2 = vld [vmem:[%s207_s0 + $0xe] sm:$0x1]  }
   0x2   :  { %7 = vrot.lane.b32.xlu0 %v101_v0, %s131_s10  ;;  %19 = vrot.lane.b32.xlu1 %v103_v1, %s132_s11  ;;  %v104_v3 = vld [vmem:[%s207_s0 + $0xc] sm:$0x1]   ;;  %s133_s16 = smov 112   ;;  %s134_s17 = smov 96   ;;  %v105_v4 = vld [vmem:[%s207_s0 + $0xb] sm:$0x1]  }
   0x3   :  { %v106_v5 = vld [vmem:[%s207_s0 + $0xa] sm:$0x1]   ;;  %v2_v6 = vld [vmem:[%s207_s0] sm:$0x1]   ;;  %s135_s24 = smov 88   ;;  %s136_s25 = smov 80  }
   0x4   :  { %4 = vst.msk [vmem:[#allocation0] sm:$0x1] %vm3_vm0, %v2_v6   ;;  %v107_v7 = vld [vmem:[%s207_s0 + $0x9] sm:$0x1]   ;;  %v108_v8 = vld [vmem:[%s207_s0 + $0x8] sm:$0x1]  }
   0x5   :  { %s137_s30 = smov 72   ;;  %s138_s2 = smov 64   ;;  %v109_v9 = vld [vmem:[%s207_s0 + $0x7] sm:$0x1]   ;;  %v110_v10 = vld [vmem:[%s207_s0 + $0x6] sm:$0x1]  }
   0x6   :  { %13 = vrot.lane.b32.xlu0 %v102_v2, %s133_s16  ;;  %25 = vrot.lane.b32.xlu1 %v104_v3, %s134_s17  ;;  %s139_s7 = smov 56   ;;  %s140_s8 = smov 48   ;;  %v111_v11 = vld [vmem:[%s207_s0 + $0x5] sm:$0x1]   ;;  %v112_v12 = vld [vmem:[%s207_s0 + $0x4] sm:$0x1]  }
   0x7   :  { %s141_s13 = smov 40   ;;  %s142_s14 = smov 32   ;;  %v113_v13 = vld [vmem:[%s207_s0 + $0x3] sm:$0x1]   ;;  %v114_v14 = vld [vmem:[%s207_s0 + $0x2] sm:$0x1]  }
   0x8   :  { %s143_s19 = smov 24   ;;  %s144_s20 = smov 16   ;;  %v115_v15 = vld [vmem:[%s207_s0 + $0x1] sm:$0x1]   ;;  %vm27_vm4 = vcmask 851712   ;;  %vm33_vm5 = vcmask 786112  }
   0x9   :  { %s145_s0 = smov 8   ;;  %vm39_vm6 = vcmask 720512   ;;  %vm45_vm7 = vcmask 654912   ;;  %vm51_vm8 = vcmask 589312   ;;  %vm57_vm9 = vcmask 523712  }
   0xa   :  { %31 = vrot.lane.b32.xlu0 %v105_v4, %s135_s24  ;;  %37 = vrot.lane.b32.xlu1 %v106_v5, %s136_s25  ;;  %vm63_vm10 = vcmask 458112   ;;  %vm69_vm11 = vcmask 392512   ;;  %vm75_vm12 = vcmask 326912   ;;  %vm81_vm13 = vcmask 261312  }
   0xb   :  { %vm87_vm14 = vcmask 195712   ;;  %vm93_vm15 = vcmask 130112  }
   0xe   :  { %43 = vrot.lane.b32.xlu0 %v107_v7, %s137_s30  ;;  %49 = vrot.lane.b32.xlu1 %v108_v8, %s138_s2 }
  0x12   :  { %55 = vrot.lane.b32.xlu0 %v109_v9, %s139_s7  ;;  %61 = vrot.lane.b32.xlu1 %v110_v10, %s140_s8 }
  0x16   :  { %67 = vrot.lane.b32.xlu0 %v111_v11, %s141_s13  ;;  %73 = vrot.lane.b32.xlu1 %v112_v12, %s142_s14 }
  0x1a   :  { %79 = vrot.lane.b32.xlu0 %v113_v13, %s143_s19  ;;  %85 = vrot.lane.b32.xlu1 %v114_v14, %s144_s20 }
  0x1e   :  { %91 = vrot.lane.b32.xlu0 %v115_v15, %s145_s0 }
  0x74   :  { %v8_v16 = vpop.permute.xlu0 %7   ;;  %v20_v17 = vpop.permute.xlu1 %19  }
  0x75   :  { %10 = vst.msk [vmem:[#allocation0] sm:$0x1] %vm9_vm1, %v8_v16  }
  0x78   :  { %v14_v18 = vpop.permute.xlu0 %13   ;;  %v26_v19 = vpop.permute.xlu1 %25  }
  0x79   :  { %16 = vst.msk [vmem:[#allocation0] sm:$0x1] %vm15_vm2, %v14_v18  }
  0x7a   :  { %22 = vst.msk [vmem:[#allocation0] sm:$0x1] %vm21_vm3, %v20_v17  }
  0x7b   :  { %28 = vst.msk [vmem:[#allocation0] sm:$0x1] %vm27_vm4, %v26_v19  }
  0x7c   :  { %v32_v20 = vpop.permute.xlu0 %31   ;;  %v38_v21 = vpop.permute.xlu1 %37  }
  0x7d   :  { %34 = vst.msk [vmem:[#allocation0] sm:$0x1] %vm33_vm5, %v32_v20  }
  0x7e   :  { %40 = vst.msk [vmem:[#allocation0] sm:$0x1] %vm39_vm6, %v38_v21  }
  0x80   :  { %v44_v22 = vpop.permute.xlu0 %43   ;;  %v50_v23 = vpop.permute.xlu1 %49  }
  0x81   :  { %46 = vst.msk [vmem:[#allocation0] sm:$0x1] %vm45_vm7, %v44_v22  }
  0x82   :  { %52 = vst.msk [vmem:[#allocation0] sm:$0x1] %vm51_vm8, %v50_v23  }
  0x84   :  { %v56_v24 = vpop.permute.xlu0 %55   ;;  %v62_v25 = vpop.permute.xlu1 %61  }
  0x85   :  { %58 = vst.msk [vmem:[#allocation0] sm:$0x1] %vm57_vm9, %v56_v24  }
  0x86   :  { %64 = vst.msk [vmem:[#allocation0] sm:$0x1] %vm63_vm10, %v62_v25  }
  0x88   :  { %v68_v26 = vpop.permute.xlu0 %67   ;;  %v74_v27 = vpop.permute.xlu1 %73  }
  0x89   :  { %70 = vst.msk [vmem:[#allocation0] sm:$0x1] %vm69_vm11, %v68_v26  }
  0x8a   :  { %76 = vst.msk [vmem:[#allocation0] sm:$0x1] %vm75_vm12, %v74_v27  }
  0x8c   :  { %v80_v28 = vpop.permute.xlu0 %79   ;;  %v86_v29 = vpop.permute.xlu1 %85  }
  0x8d   :  { %82 = vst.msk [vmem:[#allocation0] sm:$0x1] %vm81_vm13, %v80_v28  }
  0x8e   :  { %88 = vst.msk [vmem:[#allocation0] sm:$0x1] %vm87_vm14, %v86_v29  }
  0x90   :  { %v92_v30 = vpop.permute.xlu0 %91  }
  0x91   :  { %94 = vst.msk [vmem:[#allocation0] sm:$0x1] %vm93_vm15, %v92_v30  }
  0x98   :  { %v98_v31 = vld [vmem:[#allocation0] sm:$0x1] }
  0x99   :  { %100 = vst [vmem:[%s208_s1] sm:$0x1] %v98_v31 }

// kernel: _forward.4
= control target key start
LH: loop header
LB: loop body
LE: loop exit
PB: predicated region body
PF: predicated region fallthrough
CT: control target
= control target key end

     0   :  { %s1403_s21 = smov 0   ;;  %s1405_s22 = smov 0   ;;  %s1572_s0 = inlined_call_operand.vmem [shape: f32[2,9,9,16], index: 0, kind: input, shape index: {}]   ;;  %s1573_s1 = inlined_call_operand.vmem [shape: f32[4,16,8], index: 1, kind: input, shape index: {}]   ;;  %s1574_s2 = inlined_call_operand.vmem [shape: f32[1,16], index: 2, kind: input, shape index: {}]   ;;  %s1575_s3 = inlined_call_operand.vmem [shape: f32[1,16], index: 3, kind: input, shape index: {}]   ;;  %s1576_s4 = inlined_call_operand.vmem [shape: f32[1,8], index: 4, kind: input, shape index: {}]   ;;  %s1577_s5 = inlined_call_operand.vmem [shape: f32[2,8,8,8], index: 5, kind: output, shape index: {0}]   ;;  %s1578_s6 = inlined_call_operand.vmem [shape: f32[2,1,2,8], index: 6, kind: output, shape index: {1}]  }
   0x1   :  { %s1407_s23 = smov 0  }
   0x2 LB: > { %s29_s2 = sadd.s32 1, %s1362_s22  ;;  %p1113_p0 = scmp.ge.s32.totalorder %s1366_s23, 1  ;;  %s1366_s23 = sphi %s1407_s23, %s17_s23   ;;  %s1362_s22 = sphi %s1405_s22, %s1580_s22   ;;  %s1358_s21 = sphi %s1403_s21, %s1579_s21  }
   0x3   : > { %p31_p1 = scmp.ge.s32.totalorder %s29_s2, 2  ;;  %p231_p2 = scmp.lt.s32.totalorder %s1366_s23, 3 }
   0x5   : > { %s1582_s2 = smov (%p31_p1, %s29_s2), 0  ;;  %p232_p3 = pnand %p1113_p0, %p231_p2 }
   0x6   : > { %v1118_v0 = vld [vmem:[%s1573_s1 + $0x10] sm:$0xff] (!%p232_p3)  ;;  %v1119_v1 = vld [vmem:[%s1573_s1 + $0x18] sm:$0xff] (!%p232_p3)  ;;  %v1144_v2 = vld [vmem:[%s1573_s1 + $0x20] sm:$0xff] (!%p232_p3)  ;;  %p272_p4 = scmp.lt.s32.totalorder (!%p232_p3), %s1358_s21, 1  ;;  %vm316_vm0 = vcmask (!%p232_p3), 130048   ;;  %vm318_vm1 = vcmask (!%p232_p3), 122880  }
   0x7   : > { %235 = sbr.rel (%p232_p3) target bundleno = 293 (0x125), region = 40  ;;  %v1279_v3 = vpack.c.bf16 (!%p232_p3), %v1119_v1, %v1118_v0  ;;  %v1145_v4 = vld [vmem:[%s1573_s1 + $0x28] sm:$0xff] (!%p232_p3)  ;;  %v347_v5 = vld [vmem:[%s1573_s1] sm:$0xff] (!%p232_p3)  ;;  %v1162_v9 = vld [vmem:[%s1573_s1 + $0x30] sm:$0xff] (!%p232_p3)  ;;  %vm918_vm2 = vcmask (!%p232_p3), 64512   ;;  %vm977_vm3 = vcmask (!%p232_p3), 1040384  }
   0x8   : > { %v348_v6 = vld [vmem:[%s1573_s1 + $0x8] sm:$0xff] (!%p232_p3)  ;;  %v1287_v7 = vpack.c.bf16 (!%p232_p3), %v1145_v4, %v1144_v2  ;;  %v1163_v10 = vld [vmem:[%s1573_s1 + $0x38] sm:$0xff] (!%p232_p3)  ;;  %vm979_vm4 = vcmask (!%p232_p3), 58368  }
   0x9   : > { %v1283_v8 = vpack.c.bf16 (!%p232_p3), %v348_v6, %v347_v5  ;;  %1280 = vmatprep.subr.bf16.mxu1 (!%p232_p3), %v1279_v3  ;;  %v1291_v11 = vpack.c.bf16 (!%p232_p3), %v1163_v10, %v1162_v9 }
   0xa   : > { %1288 = vmatprep.subr.bf16.mxu0 (!%p232_p3), %v1287_v7  ;;  %1282 = vmatpush3.bf16.msra.mxu1 (!%p232_p3), %v1279_v3 }
   0xb   : > { %1290 = vmatpush3.bf16.msra.mxu0 (!%p232_p3), %v1287_v7  ;;  %1284 = vmatprep.subr.bf16.mxu1 (!%p232_p3), %v1283_v8 }
   0xc   : > { %1292 = vmatprep.subr.bf16.mxu0 (!%p232_p3), %v1291_v11 }
   0xe   : > { %s1584_s21 = smov (!%p272_p4, %s1358_s21), 1 }
   0xf   : > { %s1319_s14 = smul.u32 144, %s1584_s21  ;;  %s1174_s18 = sshll.u32 %s1584_s21, 6 }
  0x10   : > { %s1525_s3 = scalar_lea.vmem %s1577_s5, %s1174_s18  ;;  %s1117_s4 = sshll.u32 %s1584_s21, 1 }
  0x11   : > { %s1451_s17 = scalar_lea.vmem %s1572_s0, %s1319_s14  ;;  %s293_s26 = scalar_lea.vmem %s1578_s6, %s1117_s4 }
  0x12   : > { %v298_v12 = vld [vmem:[%s1451_s17] sm:$0xff]  ;;  %v299_v13 = vld [vmem:[%s1451_s17 + $0x8] sm:$0x1]  ;;  %v300_v14 = vld [vmem:[%s1451_s17 + $0x10] sm:$0xff] }
  0x13   : > { %317 = vst.msk [vmem:[#allocation2] sm:$0xff] %vm316_vm0, %v298_v12  ;;  %320 = vst.msk [vmem:[#allocation2 + $0x10] sm:$0xff] %vm316_vm0, %v300_v14  ;;  %v301_v15 = vld [vmem:[%s1451_s17 + $0x18] sm:$0x1]  ;;  %v302_v16 = vld [vmem:[%s1451_s17 + $0x20] sm:$0xff] }
  0x14   : > { %319 = vst.msk [vmem:[#allocation2 + $0x8] sm:$0x1] %vm318_vm1, %v299_v13  ;;  %v303_v17 = vld [vmem:[%s1451_s17 + $0x28] sm:$0x1]  ;;  %321 = vst.msk [vmem:[#allocation2 + $0x18] sm:$0x1] %vm318_vm1, %v301_v15 }
  0x15   : > { %322 = vst.msk [vmem:[#allocation2 + $0x20] sm:$0xff] %vm316_vm0, %v302_v16  ;;  %v304_v18 = vld [vmem:[%s1451_s17 + $0x30] sm:$0xff]  ;;  %v305_v19 = vld [vmem:[%s1451_s17 + $0x38] sm:$0x1]  ;;  %v306_v20 = vld [vmem:[%s1451_s17 + $0x40] sm:$0xff] }
  0x16   : > { %323 = vst.msk [vmem:[#allocation2 + $0x28] sm:$0x1] %vm318_vm1, %v303_v17  ;;  %325 = vst.msk [vmem:[#allocation2 + $0x38] sm:$0x1] %vm318_vm1, %v305_v19  ;;  %v307_v21 = vld [vmem:[%s1451_s17 + $0x48] sm:$0x1] }
  0x17   : > { %324 = vst.msk [vmem:[#allocation2 + $0x30] sm:$0xff] %vm316_vm0, %v304_v18  ;;  %326 = vst.msk [vmem:[#allocation2 + $0x40] sm:$0xff] %vm316_vm0, %v306_v20  ;;  %v308_v22 = vld [vmem:[%s1451_s17 + $0x50] sm:$0xff]  ;;  %v309_v23 = vld [vmem:[%s1451_s17 + $0x58] sm:$0x1] }
  0x18   : > { %327 = vst.msk [vmem:[#allocation2 + $0x48] sm:$0x1] %vm318_vm1, %v307_v21  ;;  %329 = vst.msk [vmem:[#allocation2 + $0x58] sm:$0x1] %vm318_vm1, %v309_v23  ;;  %v310_v24 = vld [vmem:[%s1451_s17 + $0x60] sm:$0xff]  ;;  %v312_v26 = vld [vmem:[%s1451_s17 + $0x70] sm:$0xff] }
  0x19   : > { %328 = vst.msk [vmem:[#allocation2 + $0x50] sm:$0xff] %vm316_vm0, %v308_v22  ;;  %v311_v25 = vld [vmem:[%s1451_s17 + $0x68] sm:$0x1]  ;;  %330 = vst.msk [vmem:[#allocation2 + $0x60] sm:$0xff] %vm316_vm0, %v310_v24  ;;  %v313_v27 = vld [vmem:[%s1451_s17 + $0x78] sm:$0x1] }
  0x1a   : > { %331 = vst.msk [vmem:[#allocation2 + $0x68] sm:$0x1] %vm318_vm1, %v311_v25  ;;  %v314_v28 = vld [vmem:[%s1451_s17 + $0x80] sm:$0xff]  ;;  %v315_v29 = vld [vmem:[%s1451_s17 + $0x88] sm:$0x1]  ;;  %v1136_v31 = vld [vmem:[#allocation2 + $0x10] sm:$0xff] }
  0x1b   : > { %332 = vst.msk [vmem:[#allocation2 + $0x70] sm:$0xff] %vm316_vm0, %v312_v26  ;;  %334 = vst.msk [vmem:[#allocation2 + $0x80] sm:$0xff] %vm316_vm0, %v314_v28  ;;  %v349_v30 = vld [vmem:[#allocation2 + $0x1] sm:$0xff]  ;;  %1251 = vmatprep.mubr.msk.f32.mxu0 %vm316_vm0, %v1136_v31  ;;  %v350_v32 = vld [vmem:[#allocation2 + $0x11] sm:$0xff] }
  0x1c   : > { %333 = vst.msk [vmem:[#allocation2 + $0x78] sm:$0x1] %vm318_vm1, %v313_v27  ;;  %335 = vst.msk [vmem:[#allocation2 + $0x88] sm:$0x1] %vm318_vm1, %v315_v29  ;;  %1219 = vmatprep.mubr.msk.f32.mxu1 %vm316_vm0, %v349_v30  ;;  %v1137_v33 = vld [vmem:[#allocation2 + $0x20] sm:$0xff] }
  0x1d   : > { %v351_v34 = vld [vmem:[#allocation2 + $0x21] sm:$0xff]  ;;  %1220 = vmatmul.mubr.msk.f32.vlgmr.msra.gmra.mrb[0].mxu1 %vm316_vm0, %v350_v32  ;;  %1252 = vmatmul.mubr.msk.f32.vlgmr.msra.gmra.mrb[0].mxu0 %vm316_vm0, %v1137_v33 }
  0x1e   : > { %v1138_v35 = vld [vmem:[#allocation2 + $0x30] sm:$0xff]  ;;  %1286 = vmatpush3.bf16.msra.mxu1 %v1283_v8  ;;  %1294 = vmatpush3.bf16.msra.mxu0 %v1291_v11  ;;  %v1139_v37 = vld [vmem:[#allocation2 + $0x40] sm:$0xff] }
  0x1f   : > { %v352_v36 = vld [vmem:[#allocation2 + $0x31] sm:$0xff]  ;;  %1222 = vmatprep.mubr.msk.f32.mxu1 %vm316_vm0, %v351_v34  ;;  %1254 = vmatprep.mubr.msk.f32.mxu0 %vm316_vm0, %v1138_v35  ;;  %v353_v38 = vld [vmem:[#allocation2 + $0x41] sm:$0xff] }
  0x20   : > { %v1140_v39 = vld [vmem:[#allocation2 + $0x50] sm:$0xff]  ;;  %v1141_v41 = vld [vmem:[#allocation2 + $0x60] sm:$0xff] }
  0x21   : > { %1223 = vmatmul.mubr.msk.f32.gmra.mrb[2].mxu1 %vm316_vm0, %v352_v36  ;;  %1255 = vmatmul.mubr.msk.f32.gmra.mrb[2].mxu0 %vm316_vm0, %v1139_v37  ;;  %v354_v40 = vld [vmem:[#allocation2 + $0x51] sm:$0xff]  ;;  %v355_v42 = vld [vmem:[#allocation2 + $0x61] sm:$0xff] }
  0x22   : > { %1225 = vmatprep.mubr.msk.f32.mxu1 %vm316_vm0, %v353_v38  ;;  %1257 = vmatprep.mubr.msk.f32.mxu0 %vm316_vm0, %v1140_v39  ;;  %v1142_v43 = vld [vmem:[#allocation2 + $0x70] sm:$0xff]  ;;  %v1143_v45 = vld [vmem:[#allocation2 + $0x80] sm:$0xff] }
  0x23   : > { %v356_v44 = vld [vmem:[#allocation2 + $0x71] sm:$0xff]  ;;  %v339_v46 = vld [vmem:[#allocation2] sm:$0xff] }
  0x24   : > { %v1161_v47 = vld [vmem:[#allocation2 + $0x81] sm:$0xff] }
  0x25   : > { %1226 = vmatmul.mubr.msk.f32.gmra.mrb[4].mxu1 %vm316_vm0, %v354_v40  ;;  %1258 = vmatmul.mubr.msk.f32.gmra.mrb[4].mxu0 %vm316_vm0, %v1141_v41 }
  0x26   : > { %1228 = vmatprep.mubr.msk.f32.mxu1 %vm316_vm0, %v355_v42  ;;  %1260 = vmatprep.mubr.msk.f32.mxu0 %vm316_vm0, %v1142_v43 }
  0x29   : > { %1229 = vmatmul.mubr.msk.f32.gmra.mrb[6].mxu1 %vm316_vm0, %v356_v44  ;;  %1261 = vmatmul.mubr.msk.f32.gmra.mrb[6].mxu0 %vm316_vm0, %v1143_v45 }
  0x2a   : > { %1235 = vmatprep.mubr.msk.f32.mxu1 %vm316_vm0, %v339_v46  ;;  %1267 = vmatprep.mubr.msk.f32.mxu0 %vm316_vm0, %v350_v32 }
  0x2d   : > { %1236 = vmatmul.mubr.msk.f32.vlgmr.msra.gmra.mrb[0].mxu1 %vm316_vm0, %v1136_v31  ;;  %1268 = vmatmul.mubr.msk.f32.vlgmr.msra.gmra.mrb[0].mxu0 %vm316_vm0, %v351_v34 }
  0x2e   : > { %1238 = vmatprep.mubr.msk.f32.mxu1 %vm316_vm0, %v1137_v33  ;;  %1270 = vmatprep.mubr.msk.f32.mxu0 %vm316_vm0, %v352_v36 }
  0x31   : > { %1239 = vmatmul.mubr.msk.f32.gmra.mrb[2].mxu1 %vm316_vm0, %v1138_v35  ;;  %1271 = vmatmul.mubr.msk.f32.gmra.mrb[2].mxu0 %vm316_vm0, %v353_v38 }
  0x32   : > { %1241 = vmatprep.mubr.msk.f32.mxu1 %vm316_vm0, %v1139_v37  ;;  %1273 = vmatprep.mubr.msk.f32.mxu0 %vm316_vm0, %v354_v40 }
  0x35   : > { %1242 = vmatmul.mubr.msk.f32.gmra.mrb[4].mxu1 %vm316_vm0, %v1140_v39  ;;  %1274 = vmatmul.mubr.msk.f32.gmra.mrb[4].mxu0 %vm316_vm0, %v355_v42 }
  0x36   : > { %1244 = vmatprep.mubr.msk.f32.mxu1 %vm316_vm0, %v1141_v41  ;;  %1276 = vmatprep.mubr.msk.f32.mxu0 %vm316_vm0, %v356_v44 }
  0x39   : > { %1245 = vmatmul.mubr.msk.f32.gmra.mrb[6].mxu1 %vm316_vm0, %v1142_v43  ;;  %1277 = vmatmul.mubr.msk.f32.gmra.mrb[6].mxu0 %vm316_vm0, %v1161_v47 }
 0x100   : > { %v1237_v48 = vpop.f32.mrb[0].mxu1  ;;  %v1269_v49 = vpop.f32.mrb[0].mxu0 }
 0x101   : > { %v1295_v50 = vadd.f32 %v1269_v49, %v1237_v48  ;;  %v580_v51 = vpop.f32.mrb[1].mxu1  ;;  %v871_v52 = vpop.f32.mrb[1].mxu0 }
 0x102   : > { %v1296_v53 = vadd.f32 %v871_v52, %v580_v51 }
 0x103   : > { %920 = vst.msk [vmem:[%s1525_s3 + $0x8] sm:$0xff] %vm918_vm2, %v1295_v50  ;;  %v928_v54 = vsel %vm918_vm2, %v1295_v50, 0.0  ;;  %v949_v55 = vmul.f32 %v1295_v50, %v1295_v50 }
 0x104   : > { %919 = vst.msk [vmem:[%s1525_s3] sm:$0xff] %vm918_vm2, %v1296_v53  ;;  %v927_v56 = vsel %vm918_vm2, %v1296_v53, 0.0  ;;  %v948_v57 = vmul.f32 %v1296_v53, %v1296_v53  ;;  %v1240_v58 = vpop.f32.mrb[2].mxu1  ;;  %v1272_v59 = vpop.f32.mrb[2].mxu0 }
 0x105   : > { %v957_v60 = vsel %vm918_vm2, %v949_v55, 0.0  ;;  %v929_v61 = vadd.f32 %v928_v54, %v927_v56  ;;  %v1297_v62 = vadd.f32 %v1272_v59, %v1240_v58  ;;  %v590_v63 = vpop.f32.mrb[3].mxu1  ;;  %v881_v0 = vpop.f32.mrb[3].mxu0 }
 0x106   : > { %v956_v1 = vsel %vm918_vm2, %v948_v57, 0.0  ;;  %v1298_v2 = vadd.f32 %v881_v0, %v590_v63 }
 0x107   : > { %v958_v3 = vadd.f32 %v957_v60, %v956_v1  ;;  %922 = vst.msk [vmem:[%s1525_s3 + $0x18] sm:$0xff] %vm918_vm2, %v1297_v62  ;;  %v951_v4 = vmul.f32 %v1297_v62, %v1297_v62  ;;  %v932_v13 = vsel %vm918_vm2, %v1297_v62, 0.0 }
 0x108   : > { %921 = vst.msk [vmem:[%s1525_s3 + $0x10] sm:$0xff] %vm918_vm2, %v1298_v2  ;;  %v930_v5 = vsel %vm918_vm2, %v1298_v2, 0.0  ;;  %v950_v6 = vmul.f32 %v1298_v2, %v1298_v2  ;;  %v1243_v7 = vpop.f32.mrb[4].mxu1  ;;  %v1275_v8 = vpop.f32.mrb[4].mxu0 }
 0x109   : > { %v931_v9 = vadd.f32 %v930_v5, %v929_v61  ;;  %v1299_v10 = vadd.f32 %v1275_v8, %v1243_v7  ;;  %v600_v11 = vpop.f32.mrb[5].mxu1  ;;  %v891_v12 = vpop.f32.mrb[5].mxu0  ;;  %v961_v18 = vsel %vm918_vm2, %v951_v4, 0.0 }
 0x10a   : > { %v959_v14 = vsel %vm918_vm2, %v950_v6, 0.0  ;;  %v1300_v15 = vadd.f32 %v891_v12, %v600_v11 }
 0x10b   : > { %v960_v16 = vadd.f32 %v959_v14, %v958_v3  ;;  %924 = vst.msk [vmem:[%s1525_s3 + $0x28] sm:$0xff] %vm918_vm2, %v1299_v10  ;;  %v933_v17 = vadd.f32 %v932_v13, %v931_v9  ;;  %v953_v19 = vmul.f32 %v1299_v10, %v1299_v10  ;;  %v936_v29 = vsel %vm918_vm2, %v1299_v10, 0.0 }
 0x10c   : > { %923 = vst.msk [vmem:[%s1525_s3 + $0x20] sm:$0xff] %vm918_vm2, %v1300_v15  ;;  %v934_v20 = vsel %vm918_vm2, %v1300_v15, 0.0  ;;  %v952_v21 = vmul.f32 %v1300_v15, %v1300_v15  ;;  %v1246_v22 = vpop.f32.mrb[6].mxu1  ;;  %v1278_v23 = vpop.f32.mrb[6].mxu0 }
 0x10d   : > { %v935_v24 = vadd.f32 %v934_v20, %v933_v17  ;;  %v962_v25 = vadd.f32 %v961_v18, %v960_v16  ;;  %v1301_v26 = vadd.f32 %v1278_v23, %v1246_v22  ;;  %v610_v27 = vpop.f32.mrb[7].mxu1  ;;  %v901_v28 = vpop.f32.mrb[7].mxu0  ;;  %v965_v34 = vsel %vm918_vm2, %v953_v19, 0.0 }
 0x10e   : > { %v963_v30 = vsel %vm918_vm2, %v952_v21, 0.0  ;;  %v1302_v31 = vadd.f32 %v901_v28, %v610_v27 }
 0x10f   : > { %v964_v32 = vadd.f32 %v963_v30, %v962_v25  ;;  %926 = vst.msk [vmem:[%s1525_s3 + $0x38] sm:$0xff] %vm918_vm2, %v1301_v26  ;;  %v937_v33 = vadd.f32 %v936_v29, %v935_v24  ;;  %v955_v35 = vmul.f32 %v1301_v26, %v1301_v26  ;;  %v940_v40 = vsel %vm918_vm2, %v1301_v26, 0.0 }
 0x110   : > { %925 = vst.msk [vmem:[%s1525_s3 + $0x30] sm:$0xff] %vm918_vm2, %v1302_v31  ;;  %v938_v36 = vsel %vm918_vm2, %v1302_v31, 0.0  ;;  %v954_v37 = vmul.f32 %v1302_v31, %v1302_v31 }
 0x111   : > { %v939_v38 = vadd.f32 %v938_v36, %v937_v33  ;;  %v966_v39 = vadd.f32 %v965_v34, %v964_v32  ;;  %v969_v44 = vsel %vm918_vm2, %v955_v35, 0.0 }
 0x112   : > { %v967_v41 = vsel %vm918_vm2, %v954_v37, 0.0 }
 0x113   : > { %v941_v42 = vadd.f32 %v940_v40, %v939_v38  ;;  %v968_v43 = vadd.f32 %v967_v41, %v966_v39 }
 0x115   : > { %v942_v45 = vrot.slane %v941_v42, 4  ;;  %v970_v46 = vadd.f32 %v969_v44, %v968_v43 }
 0x117   : > { %v943_v47 = vadd.f32 %v942_v45, %v941_v42  ;;  %v971_v48 = vrot.slane %v970_v46, 4 }
 0x119   : > { %v944_v49 = vrot.slane %v943_v47, 2  ;;  %v972_v50 = vadd.f32 %v971_v48, %v970_v46 }
 0x11b   : > { %v945_v51 = vadd.f32 %v944_v49, %v943_v47  ;;  %v973_v52 = vrot.slane %v972_v50, 2 }
 0x11d   : > { %v946_v53 = vrot.slane %v945_v51, 1  ;;  %v974_v54 = vadd.f32 %v973_v52, %v972_v50 }
 0x11f   : > { %v975_v55 = vrot.slane %v974_v54, 1  ;;  %v947_v56 = vadd.f32 %v946_v53, %v945_v51 }
 0x121   : > { %v976_v57 = vadd.f32 %v975_v55, %v974_v54 }
 0x123   : > { %v978_v58 = vsel %vm977_vm3, %v947_v56, %v976_v57 }
 0x124   : > { %980 = vst.msk [vmem:[%s293_s26] sm:$0x3] %vm979_vm4, %v978_v58 }
 0x125 PF: > { %s17_s23 = sadd.s32 1, %s1366_s23   ;;  %s1579_s21 = smov %s1362_s22 }
 0x126   : > { %p14_p5 = scmp.ge.s32.totalorder %s17_s23, 4   ;;  %s1580_s22 = smov %s1582_s2 }
 0x128   :  { %16 = sbr.rel (!%p14_p5) target bundleno = 2 (0x2), region = 91 }

// kernel: _forward.5
= control target key start
LH: loop header
LB: loop body
LE: loop exit
PB: predicated region body
PF: predicated region fallthrough
CT: control target
= control target key end

     0   :  { %s2387_s21 = smov 0   ;;  %s2389_s22 = smov 0   ;;  %s2675_s0 = inlined_call_operand.vmem [shape: f32[2,8,8,8], index: 0, kind: input, shape index: {}]   ;;  %s2676_s1 = inlined_call_operand.vmem [shape: f32[9,8,8], index: 1, kind: input, shape index: {}]   ;;  %s2677_s2 = inlined_call_operand.vmem [shape: f32[1,8], index: 2, kind: input, shape index: {}]   ;;  %s2678_s3 = inlined_call_operand.vmem [shape: f32[1,8], index: 3, kind: input, shape index: {}]   ;;  %s2679_s4 = inlined_call_operand.vmem [shape: f32[1,8], index: 4, kind: input, shape index: {}]   ;;  %s2680_s5 = inlined_call_operand.vmem [shape: f32[2,8,8,8], index: 5, kind: output, shape index: {0}]   ;;  %s2681_s6 = inlined_call_operand.vmem [shape: f32[2,1,2,8], index: 6, kind: output, shape index: {1}]  }
   0x1   :  { %s2391_s23 = smov 0  }
   0x2 LB: > { %s29_s4 = sadd.s32 1, %s2345_s22  ;;  %p1889_p0 = scmp.ge.s32.totalorder %s2349_s23, 1  ;;  %s2349_s23 = sphi %s2391_s23, %s17_s23   ;;  %s2345_s22 = sphi %s2389_s22, %s2683_s22   ;;  %s2341_s21 = sphi %s2387_s21, %s2682_s21  }
   0x3   : > { %p31_p1 = scmp.ge.s32.totalorder %s29_s4, 2  ;;  %p231_p2 = scmp.lt.s32.totalorder %s2349_s23, 3 }
   0x5   : > { %s2685_s4 = smov (%p31_p1, %s29_s4), 0  ;;  %p232_p3 = pnand %p1889_p0, %p231_p2 }
   0x6   : > { %v1897_v0 = vld [vmem:[%s2676_s1 + $0x8] sm:$0xff] (!%p232_p3)  ;;  %v2413_v1 = vld [vmem:[%s2676_s1 + $0x20] sm:$0xff] (!%p232_p3)  ;;  %vm344_vm0 = vcmask (!%p232_p3), 64512   ;;  %vm346_vm1 = vcmask (!%p232_p3), 58368   ;;  %p272_p4 = scmp.lt.s32.totalorder (!%p232_p3), %s2341_s21, 1  ;;  %v2351_v2 = vmov (!%p232_p3), 0.0  }
   0x7   : > { %235 = sbr.rel (%p232_p3) target bundleno = 337 (0x151), region = 40  ;;  %2110 = vmatprep.subr.mxu1 (!%p232_p3), %v1897_v0  ;;  %2166 = vmatprep.subr.mxu0 (!%p232_p3), %v2413_v1  ;;  %345 = vst.msk [vmem:[#allocation2] sm:$0xff] (!%p232_p3), %vm344_vm0, %v2351_v2  ;;  %348 = vst.msk [vmem:[#allocation2 + $0x10] sm:$0xff] (!%p232_p3), %vm344_vm0, %v2351_v2  ;;  %v386_v3 = vld [vmem:[%s2676_s1] sm:$0xff] (!%p232_p3)  ;;  %v1965_v4 = vld [vmem:[%s2676_s1 + $0x28] sm:$0xff] (!%p232_p3)  ;;  %vm1749_vm2 = vcmask (!%p232_p3), 1040384  }
   0x8   : > { %347 = vst.msk [vmem:[#allocation2 + $0x8] sm:$0x3] (!%p232_p3), %vm346_vm1, %v2351_v2  ;;  %349 = vst.msk [vmem:[#allocation2 + $0x18] sm:$0x3] (!%p232_p3), %vm346_vm1, %v2351_v2  ;;  %2111 = vmatpush3.msra.mxu1 (!%p232_p3), %v1897_v0  ;;  %2167 = vmatpush3.msra.mxu0 (!%p232_p3), %v2413_v1  ;;  %v1895_v5 = vld [vmem:[%s2677_s2] ss:$0 sm:$0xff] (!%p232_p3) }
   0x9   : > { %350 = vst.msk [vmem:[#allocation2 + $0x20] sm:$0xff] (!%p232_p3), %vm344_vm0, %v2351_v2  ;;  %352 = vst.msk [vmem:[#allocation2 + $0x30] sm:$0xff] (!%p232_p3), %vm344_vm0, %v2351_v2  ;;  %2124 = vmatprep.subr.mxu1 (!%p232_p3), %v386_v3  ;;  %2180 = vmatprep.subr.mxu0 (!%p232_p3), %v1965_v4  ;;  %v1896_v6 = vld [vmem:[%s2678_s3] ss:$0 sm:$0xff] (!%p232_p3)  ;;  %v1982_v43 = vld [vmem:[%s2676_s1 + $0x30] sm:$0xff] (!%p232_p3) }
   0xa   : > { %351 = vst.msk [vmem:[#allocation2 + $0x28] sm:$0x3] (!%p232_p3), %vm346_vm1, %v2351_v2  ;;  %353 = vst.msk [vmem:[#allocation2 + $0x38] sm:$0x3] (!%p232_p3), %vm346_vm1, %v2351_v2  ;;  %v1914_v44 = vld [vmem:[%s2676_s1 + $0x10] sm:$0xff] (!%p232_p3)  ;;  %v1999_v51 = vld [vmem:[%s2676_s1 + $0x38] sm:$0xff] (!%p232_p3) }
   0xb   : > { %354 = vst.msk [vmem:[#allocation2 + $0x40] sm:$0xff] (!%p232_p3), %vm344_vm0, %v2351_v2  ;;  %356 = vst.msk [vmem:[#allocation2 + $0x50] sm:$0xff] (!%p232_p3), %vm344_vm0, %v2351_v2  ;;  %v1931_v60 = vld [vmem:[%s2676_s1 + $0x18] sm:$0xff] (!%p232_p3) }
   0xc   : > { %355 = vst.msk [vmem:[#allocation2 + $0x48] sm:$0x3] (!%p232_p3), %vm346_vm1, %v2351_v2  ;;  %357 = vst.msk [vmem:[#allocation2 + $0x58] sm:$0x3] (!%p232_p3), %vm346_vm1, %v2351_v2 }
   0xd   : > { %358 = vst.msk [vmem:[#allocation2 + $0x60] sm:$0xff] (!%p232_p3), %vm344_vm0, %v2351_v2  ;;  %360 = vst.msk [vmem:[#allocation2 + $0x70] sm:$0xff] (!%p232_p3), %vm344_vm0, %v2351_v2 }
   0xe   : > { %359 = vst.msk [vmem:[#allocation2 + $0x68] sm:$0x3] %vm346_vm1, %v2351_v2  ;;  %361 = vst.msk [vmem:[#allocation2 + $0x78] sm:$0x3] %vm346_vm1, %v2351_v2  ;;  %s2687_s21 = smov (!%p272_p4, %s2341_s21), 1  ;;  %v378_v54 = vld [vmem:[#allocation2] sm:$0xff] }
   0xf   : > { %362 = vst.msk [vmem:[#allocation2 + $0x80] sm:$0xff] %vm344_vm0, %v2351_v2  ;;  %364 = vst.msk [vmem:[#allocation2 + $0x90] sm:$0xff] %vm344_vm0, %v2351_v2  ;;  %s2027_s8 = sshll.u32 %s2687_s21, 6  ;;  %v387_v16 = vld [vmem:[#allocation2 + $0x1] sm:$0xff] }
  0x10   : > { %363 = vst.msk [vmem:[#allocation2 + $0x88] sm:$0x3] %vm346_vm1, %v2351_v2  ;;  %365 = vst.msk [vmem:[#allocation2 + $0x98] sm:$0x3] %vm346_vm1, %v2351_v2  ;;  %s276_s13 = scalar_lea.vmem %s2675_s0, %s2027_s8  ;;  %2112 = vmatprep.mubr.msk.f32.mxu1 %vm344_vm0, %v387_v16  ;;  %s2627_s7 = scalar_lea.vmem %s2680_s5, %s2027_s8 }
  0x11   : > { %v298_v7 = vld [vmem:[%s276_s13] sm:$0xff]  ;;  %v299_v8 = vld [vmem:[%s276_s13 + $0x8] sm:$0xff]  ;;  %v300_v9 = vld [vmem:[%s276_s13 + $0x10] sm:$0xff]  ;;  %s1894_s8 = sshll.u32 %s2687_s21, 1 }
  0x12   : > { %v313_v10 = vmul.f32 %v1895_v5, %v298_v7  ;;  %v314_v11 = vmul.f32 %v1895_v5, %v299_v8  ;;  %v315_v12 = vmul.f32 %v1895_v5, %v300_v9  ;;  %v301_v13 = vld [vmem:[%s276_s13 + $0x18] sm:$0xff]  ;;  %v302_v14 = vld [vmem:[%s276_s13 + $0x20] sm:$0xff]  ;;  %v303_v15 = vld [vmem:[%s276_s13 + $0x28] sm:$0xff]  ;;  %s293_s11 = scalar_lea.vmem %s2681_s6, %s1894_s8 }
  0x13   : > { %v316_v17 = vmul.f32 %v1895_v5, %v301_v13  ;;  %v317_v18 = vmul.f32 %v1895_v5, %v302_v14  ;;  %v318_v19 = vmul.f32 %v1895_v5, %v303_v15  ;;  %v304_v20 = vld [vmem:[%s276_s13 + $0x30] sm:$0xff]  ;;  %v305_v25 = vld [vmem:[%s276_s13 + $0x38] sm:$0xff] }
  0x14   : > { %v328_v21 = vadd.f32 %v1896_v6, %v313_v10  ;;  %v329_v22 = vadd.f32 %v1896_v6, %v314_v11  ;;  %v330_v23 = vadd.f32 %v1896_v6, %v315_v12  ;;  %v319_v24 = vmul.f32 %v1895_v5, %v304_v20 }
  0x15   : > { %v331_v26 = vadd.f32 %v1896_v6, %v316_v17  ;;  %v332_v27 = vadd.f32 %v1896_v6, %v317_v18  ;;  %v333_v28 = vadd.f32 %v1896_v6, %v318_v19  ;;  %v320_v29 = vmul.f32 %v1895_v5, %v305_v25  ;;  %v656_v5 = vld [vmem:[#allocation2 + $0x2] sm:$0xff] }
  0x16   : > { %v336_v30 = vmax.f32 %v328_v21, 0.0  ;;  %v337_v31 = vmax.f32 %v329_v22, 0.0  ;;  %v338_v32 = vmax.f32 %v330_v23, 0.0  ;;  %v334_v33 = vadd.f32 %v1896_v6, %v319_v24  ;;  %v1981_v7 = vld [vmem:[#allocation2 + $0x90] sm:$0xff] }
  0x17   : > { %v339_v34 = vmax.f32 %v331_v26, 0.0  ;;  %v340_v35 = vmax.f32 %v332_v27, 0.0  ;;  %v341_v36 = vmax.f32 %v333_v28, 0.0  ;;  %v335_v37 = vadd.f32 %v1896_v6, %v320_v29  ;;  %v1998_v9 = vld [vmem:[#allocation2 + $0x91] sm:$0xff] }
  0x18   : > { %367 = vst.msk [vmem:[#allocation2 + $0x11] sm:$0xff] %vm344_vm0, %v336_v30  ;;  %368 = vst.msk [vmem:[#allocation2 + $0x21] sm:$0xff] %vm344_vm0, %v337_v31  ;;  %v342_v38 = vmax.f32 %v334_v33, 0.0 }
  0x19   : > { %369 = vst.msk [vmem:[#allocation2 + $0x31] sm:$0xff] %vm344_vm0, %v338_v32  ;;  %370 = vst.msk [vmem:[#allocation2 + $0x41] sm:$0xff] %vm344_vm0, %v339_v34  ;;  %v343_v39 = vmax.f32 %v335_v37, 0.0 }
  0x1a   : > { %371 = vst.msk [vmem:[#allocation2 + $0x51] sm:$0xff] %vm344_vm0, %v340_v35  ;;  %372 = vst.msk [vmem:[#allocation2 + $0x61] sm:$0xff] %vm344_vm0, %v341_v36 }
  0x1b   : > { %373 = vst.msk [vmem:[#allocation2 + $0x71] sm:$0xff] %vm344_vm0, %v342_v38  ;;  %374 = vst.msk [vmem:[#allocation2 + $0x81] sm:$0xff] %vm344_vm0, %v343_v39 }
  0x1f   : > { %v388_v40 = vld [vmem:[#allocation2 + $0x11] sm:$0xff]  ;;  %v2470_v41 = vld [vmem:[#allocation2 + $0x21] sm:$0xff] }
  0x20   : > { %2113 = vmatmul.mubr.msk.f32.vlgmr.msra.gmra.mrb[0].mxu1 %vm344_vm0, %v388_v40  ;;  %2168 = vmatprep.mubr.msk.f32.mxu0 %vm344_vm0, %v388_v40  ;;  %v2474_v42 = vld [vmem:[#allocation2 + $0x31] sm:$0xff]  ;;  %v2486_v45 = vld [vmem:[#allocation2 + $0x41] sm:$0xff] }
  0x21   : > { %2125 = vmatpush3.msra.mxu1 %v386_v3  ;;  %2169 = vmatmul.mubr.msk.f32.vlgmr.msra.gmra.mrb[0].mxu0 %vm344_vm0, %v2470_v41  ;;  %v1957_v46 = vld [vmem:[#allocation2 + $0x12] sm:$0xff]  ;;  %v2499_v48 = vld [vmem:[#allocation2 + $0x22] sm:$0xff] }
  0x22   : > { %2181 = vmatpush3.msra.mxu0 %v1965_v4  ;;  %2115 = vmatprep.mubr.msk.f32.mxu1 %vm344_vm0, %v2470_v41  ;;  %v2496_v47 = vld [vmem:[#allocation2 + $0x51] sm:$0xff]  ;;  %v2501_v49 = vld [vmem:[#allocation2 + $0x61] sm:$0xff] }
  0x23   : > { %2171 = vmatprep.mubr.msk.f32.mxu0 %vm344_vm0, %v2474_v42  ;;  %2194 = vmatprep.subr.mxu0 %v1982_v43  ;;  %v2503_v50 = vld [vmem:[#allocation2 + $0x32] sm:$0xff]  ;;  %v2518_v53 = vld [vmem:[#allocation2 + $0x42] sm:$0xff] }
  0x24   : > { %2116 = vmatmul.mubr.msk.f32.gmra.mrb[2].mxu1 %vm344_vm0, %v2474_v42  ;;  %2138 = vmatprep.subr.mxu1 %v1914_v44  ;;  %v2514_v52 = vld [vmem:[#allocation2 + $0x71] sm:$0xff]  ;;  %v2529_v57 = vld [vmem:[#allocation2 + $0x62] sm:$0xff] }
  0x25   : > { %2172 = vmatmul.mubr.msk.f32.gmra.mrb[2].mxu0 %vm344_vm0, %v2486_v45  ;;  %2118 = vmatprep.mubr.msk.f32.mxu1 %vm344_vm0, %v2486_v45  ;;  %v2520_v55 = vld [vmem:[#allocation2 + $0x52] sm:$0xff]  ;;  %v380_v58 = vld [vmem:[#allocation2 + $0x20] sm:$0xff] }
  0x26   : > { %2182 = vmatprep.mubr.msk.f32.mxu0 %vm344_vm0, %v1957_v46  ;;  %v379_v56 = vld [vmem:[#allocation2 + $0x10] sm:$0xff]  ;;  %v2542_v62 = vld [vmem:[#allocation2 + $0x82] sm:$0xff] }
  0x27   : > { %v2531_v59 = vld [vmem:[#allocation2 + $0x72] sm:$0xff]  ;;  %v382_v63 = vld [vmem:[#allocation2 + $0x40] sm:$0xff] }
  0x28   : > { %2119 = vmatmul.mubr.msk.f32.gmra.mrb[4].mxu1 %vm344_vm0, %v2496_v47  ;;  %v381_v61 = vld [vmem:[#allocation2 + $0x30] sm:$0xff]  ;;  %v384_v2 = vld [vmem:[#allocation2 + $0x60] sm:$0xff] }
  0x29   : > { %2183 = vmatmul.mubr.msk.f32.vlgmr.msra.gmra.mrb[0].mxu0 %vm344_vm0, %v2499_v48  ;;  %2121 = vmatprep.mubr.msk.f32.mxu1 %vm344_vm0, %v2501_v49  ;;  %v383_v0 = vld [vmem:[#allocation2 + $0x50] sm:$0xff]  ;;  %v2016_v3 = vld [vmem:[%s2676_s1 + $0x40] sm:$0xff] }
  0x2a   : > { %2195 = vmatpush3.msra.mxu0 %v1982_v43  ;;  %2185 = vmatprep.mubr.msk.f32.mxu0 %vm344_vm0, %v2503_v50  ;;  %v385_v4 = vld [vmem:[#allocation2 + $0x70] sm:$0xff]  ;;  %v1980_v6 = vld [vmem:[#allocation2 + $0x80] sm:$0xff] }
  0x2b   : > { %2208 = vmatprep.subr.mxu0 %v1999_v51  ;;  %v1997_v8 = vld [vmem:[#allocation2 + $0x81] sm:$0xff] }
  0x2c   : > { %2122 = vmatmul.mubr.msk.f32.gmra.mrb[6].mxu1 %vm344_vm0, %v2514_v52 }
  0x2d   : > { %2186 = vmatmul.mubr.msk.f32.gmra.mrb[2].mxu0 %vm344_vm0, %v2518_v53  ;;  %2126 = vmatprep.mubr.msk.f32.mxu1 %vm344_vm0, %v378_v54 }
  0x2e   : > { %2188 = vmatprep.mubr.msk.f32.mxu0 %vm344_vm0, %v2520_v55 }
  0x30   : > { %2127 = vmatmul.mubr.msk.f32.vlgmr.msra.gmra.mrb[0].mxu1 %vm344_vm0, %v379_v56 }
  0x31   : > { %2139 = vmatpush3.msra.mxu1 %v1914_v44  ;;  %2189 = vmatmul.mubr.msk.f32.gmra.mrb[4].mxu0 %vm344_vm0, %v2529_v57 }
  0x32   : > { %2129 = vmatprep.mubr.msk.f32.mxu1 %vm344_vm0, %v380_v58  ;;  %2191 = vmatprep.mubr.msk.f32.mxu0 %vm344_vm0, %v2531_v59 }
  0x33   : > { %2152 = vmatprep.subr.mxu1 %v1931_v60 }
  0x34   : > { %2130 = vmatmul.mubr.msk.f32.gmra.mrb[2].mxu1 %vm344_vm0, %v381_v61 }
  0x35   : > { %2192 = vmatmul.mubr.msk.f32.gmra.mrb[6].mxu0 %vm344_vm0, %v2542_v62  ;;  %2132 = vmatprep.mubr.msk.f32.mxu1 %vm344_vm0, %v382_v63 }
  0x36   : > { %2196 = vmatprep.mubr.msk.f32.mxu0 %vm344_vm0, %v380_v58 }
  0x38   : > { %2133 = vmatmul.mubr.msk.f32.gmra.mrb[4].mxu1 %vm344_vm0, %v383_v0 }
  0x39   : > { %2197 = vmatmul.mubr.msk.f32.vlgmr.msra.gmra.mrb[0].mxu0 %vm344_vm0, %v381_v61  ;;  %2135 = vmatprep.mubr.msk.f32.mxu1 %vm344_vm0, %v384_v2 }
  0x3a   : > { %2209 = vmatpush3.msra.mxu0 %v1999_v51  ;;  %2199 = vmatprep.mubr.msk.f32.mxu0 %vm344_vm0, %v382_v63 }
  0x3b   : > { %2222 = vmatprep.subr.mxu0 %v2016_v3 }
  0x3c   : > { %2136 = vmatmul.mubr.msk.f32.gmra.mrb[6].mxu1 %vm344_vm0, %v385_v4 }
  0x3d   : > { %2200 = vmatmul.mubr.msk.f32.gmra.mrb[2].mxu0 %vm344_vm0, %v383_v0  ;;  %2140 = vmatprep.mubr.msk.f32.mxu1 %vm344_vm0, %v656_v5 }
  0x3e   : > { %2202 = vmatprep.mubr.msk.f32.mxu0 %vm344_vm0, %v384_v2 }
  0x40   : > { %2141 = vmatmul.mubr.msk.f32.vlgmr.msra.gmra.mrb[0].mxu1 %vm344_vm0, %v1957_v46 }
  0x41   : > { %2153 = vmatpush3.msra.mxu1 %v1931_v60  ;;  %2203 = vmatmul.mubr.msk.f32.gmra.mrb[4].mxu0 %vm344_vm0, %v385_v4 }
  0x42   : > { %2143 = vmatprep.mubr.msk.f32.mxu1 %vm344_vm0, %v2499_v48  ;;  %2205 = vmatprep.mubr.msk.f32.mxu0 %vm344_vm0, %v1980_v6 }
  0x43   : > { %2236 = vmatprep.subr.mxu1 %v2413_v1 }
  0x44   : > { %2144 = vmatmul.mubr.msk.f32.gmra.mrb[2].mxu1 %vm344_vm0, %v2503_v50 }
  0x45   : > { %2206 = vmatmul.mubr.msk.f32.gmra.mrb[6].mxu0 %vm344_vm0, %v1981_v7  ;;  %2146 = vmatprep.mubr.msk.f32.mxu1 %vm344_vm0, %v2518_v53 }
  0x46   : > { %2210 = vmatprep.mubr.msk.f32.mxu0 %vm344_vm0, %v2470_v41 }
  0x48   : > { %2147 = vmatmul.mubr.msk.f32.gmra.mrb[4].mxu1 %vm344_vm0, %v2520_v55 }
  0x49   : > { %2211 = vmatmul.mubr.msk.f32.vlgmr.msra.gmra.mrb[0].mxu0 %vm344_vm0, %v2474_v42  ;;  %2149 = vmatprep.mubr.msk.f32.mxu1 %vm344_vm0, %v2529_v57 }
  0x4a   : > { %2223 = vmatpush3.msra.mxu0 %v2016_v3  ;;  %2213 = vmatprep.mubr.msk.f32.mxu0 %vm344_vm0, %v2486_v45 }
  0x4c   : > { %2150 = vmatmul.mubr.msk.f32.gmra.mrb[6].mxu1 %vm344_vm0, %v2531_v59 }
  0x4d   : > { %2214 = vmatmul.mubr.msk.f32.gmra.mrb[2].mxu0 %vm344_vm0, %v2496_v47  ;;  %2154 = vmatprep.mubr.msk.f32.mxu1 %vm344_vm0, %v379_v56 }
  0x4e   : > { %2216 = vmatprep.mubr.msk.f32.mxu0 %vm344_vm0, %v2501_v49 }
  0x50   : > { %2155 = vmatmul.mubr.msk.f32.vlgmr.msra.gmra.mrb[0].mxu1 %vm344_vm0, %v380_v58 }
  0x51   : > { %2237 = vmatpush3.msra.mxu1 %v2413_v1  ;;  %2217 = vmatmul.mubr.msk.f32.gmra.mrb[4].mxu0 %vm344_vm0, %v2514_v52  ;;  %v2015_v1 = vld [vmem:[#allocation2 + $0x92] sm:$0xff] }
  0x52   : > { %2157 = vmatprep.mubr.msk.f32.mxu1 %vm344_vm0, %v381_v61  ;;  %2219 = vmatprep.mubr.msk.f32.mxu0 %vm344_vm0, %v1997_v8 }
  0x54   : > { %2158 = vmatmul.mubr.msk.f32.gmra.mrb[2].mxu1 %vm344_vm0, %v382_v63 }
  0x55   : > { %2220 = vmatmul.mubr.msk.f32.gmra.mrb[6].mxu0 %vm344_vm0, %v1998_v9  ;;  %2160 = vmatprep.mubr.msk.f32.mxu1 %vm344_vm0, %v383_v0 }
  0x56   : > { %2224 = vmatprep.mubr.msk.f32.mxu0 %vm344_vm0, %v2499_v48 }
  0x58   : > { %2161 = vmatmul.mubr.msk.f32.gmra.mrb[4].mxu1 %vm344_vm0, %v384_v2 }
  0x59   : > { %2225 = vmatmul.mubr.msk.f32.vlgmr.msra.gmra.mrb[0].mxu0 %vm344_vm0, %v2503_v50  ;;  %2163 = vmatprep.mubr.msk.f32.mxu1 %vm344_vm0, %v385_v4 }
  0x5a   : > { %2227 = vmatprep.mubr.msk.f32.mxu0 %vm344_vm0, %v2518_v53 }
  0x5c   : > { %2164 = vmatmul.mubr.msk.f32.gmra.mrb[6].mxu1 %vm344_vm0, %v1980_v6 }
  0x5d   : > { %2228 = vmatmul.mubr.msk.f32.gmra.mrb[2].mxu0 %vm344_vm0, %v2520_v55  ;;  %2174 = vmatprep.mubr.msk.f32.mxu1 %vm344_vm0, %v2496_v47 }
  0x5e   : > { %2230 = vmatprep.mubr.msk.f32.mxu0 %vm344_vm0, %v2529_v57 }
  0x60   : > { %2175 = vmatmul.mubr.msk.f32.vlgmr.msra.gmra.mrb[4].mxu1 %vm344_vm0, %v2501_v49 }
  0x61   : > { %2231 = vmatmul.mubr.msk.f32.gmra.mrb[4].mxu0 %vm344_vm0, %v2531_v59  ;;  %2177 = vmatprep.mubr.msk.f32.mxu1 %vm344_vm0, %v2514_v52 }
  0x62   : > { %2233 = vmatprep.mubr.msk.f32.mxu0 %vm344_vm0, %v2542_v62 }
  0x64   : > { %2178 = vmatmul.mubr.msk.f32.gmra.mrb[6].mxu1 %vm344_vm0, %v1997_v8 }
  0x65   : > { %2234 = vmatmul.mubr.msk.f32.gmra.mrb[6].mxu0 %vm344_vm0, %v2015_v1 }
 0x123   : > { %v2156_v10 = vpop.f32.mrb[0].mxu1 }
 0x124   : > { %v906_v11 = vpop.f32.mrb[1].mxu1 }
 0x127   : > { %v2159_v12 = vpop.f32.mrb[2].mxu1 }
 0x128   : > { %v916_v13 = vpop.f32.mrb[3].mxu1 }
 0x12c   : > { %v2226_v14 = vpop.f32.mrb[0].mxu0 }
 0x12d   : > { %v2238_v15 = vadd.f32 %v2226_v14, %v2156_v10  ;;  %v1644_v16 = vpop.f32.mrb[1].mxu0 }
 0x12e   : > { %v2239_v17 = vadd.f32 %v1644_v16, %v906_v11 }
 0x12f   : > { %1692 = vst.msk [vmem:[%s2627_s7 + $0x8] sm:$0xff] %vm344_vm0, %v2238_v15  ;;  %v1700_v18 = vsel %vm344_vm0, %v2238_v15, 0.0  ;;  %v1721_v19 = vmul.f32 %v2238_v15, %v2238_v15 }
 0x130   : > { %1691 = vst.msk [vmem:[%s2627_s7] sm:$0xff] %vm344_vm0, %v2239_v17  ;;  %v1699_v20 = vsel %vm344_vm0, %v2239_v17, 0.0  ;;  %v1720_v21 = vmul.f32 %v2239_v17, %v2239_v17  ;;  %v2229_v22 = vpop.f32.mrb[2].mxu0 }
 0x131   : > { %v1729_v23 = vsel %vm344_vm0, %v1721_v19, 0.0  ;;  %v1701_v24 = vadd.f32 %v1700_v18, %v1699_v20  ;;  %v2240_v25 = vadd.f32 %v2229_v22, %v2159_v12  ;;  %v1654_v26 = vpop.f32.mrb[3].mxu0 }
 0x132   : > { %v1728_v27 = vsel %vm344_vm0, %v1720_v21, 0.0  ;;  %v2241_v28 = vadd.f32 %v1654_v26, %v916_v13 }
 0x133   : > { %v1730_v29 = vadd.f32 %v1729_v23, %v1728_v27  ;;  %1694 = vst.msk [vmem:[%s2627_s7 + $0x18] sm:$0xff] %vm344_vm0, %v2240_v25  ;;  %v2176_v30 = vpop.f32.mrb[4].mxu1  ;;  %v1723_v31 = vmul.f32 %v2240_v25, %v2240_v25  ;;  %v1704_v39 = vsel %vm344_vm0, %v2240_v25, 0.0 }
 0x134   : > { %1693 = vst.msk [vmem:[%s2627_s7 + $0x10] sm:$0xff] %vm344_vm0, %v2241_v28  ;;  %v1702_v32 = vsel %vm344_vm0, %v2241_v28, 0.0  ;;  %v1722_v33 = vmul.f32 %v2241_v28, %v2241_v28  ;;  %v1073_v34 = vpop.f32.mrb[5].mxu1  ;;  %v2232_v35 = vpop.f32.mrb[4].mxu0 }
 0x135   : > { %v1703_v36 = vadd.f32 %v1702_v32, %v1701_v24  ;;  %v2242_v37 = vadd.f32 %v2232_v35, %v2176_v30  ;;  %v1664_v38 = vpop.f32.mrb[5].mxu0  ;;  %v1733_v45 = vsel %vm344_vm0, %v1723_v31, 0.0 }
 0x136   : > { %v1731_v40 = vsel %vm344_vm0, %v1722_v33, 0.0  ;;  %v2243_v41 = vadd.f32 %v1664_v38, %v1073_v34 }
 0x137   : > { %v1732_v42 = vadd.f32 %v1731_v40, %v1730_v29  ;;  %1696 = vst.msk [vmem:[%s2627_s7 + $0x28] sm:$0xff] %vm344_vm0, %v2242_v37  ;;  %v1705_v43 = vadd.f32 %v1704_v39, %v1703_v36  ;;  %v2179_v44 = vpop.f32.mrb[6].mxu1  ;;  %v1725_v46 = vmul.f32 %v2242_v37, %v2242_v37  ;;  %v1708_v55 = vsel %vm344_vm0, %v2242_v37, 0.0 }
 0x138   : > { %1695 = vst.msk [vmem:[%s2627_s7 + $0x20] sm:$0xff] %vm344_vm0, %v2243_v41  ;;  %v1706_v47 = vsel %vm344_vm0, %v2243_v41, 0.0  ;;  %v1724_v48 = vmul.f32 %v2243_v41, %v2243_v41  ;;  %v1083_v49 = vpop.f32.mrb[7].mxu1  ;;  %v2235_v50 = vpop.f32.mrb[6].mxu0 }
 0x139   : > { %v1707_v51 = vadd.f32 %v1706_v47, %v1705_v43  ;;  %v1734_v52 = vadd.f32 %v1733_v45, %v1732_v42  ;;  %v2244_v53 = vadd.f32 %v2235_v50, %v2179_v44  ;;  %v1674_v54 = vpop.f32.mrb[7].mxu0  ;;  %v1737_v60 = vsel %vm344_vm0, %v1725_v46, 0.0 }
 0x13a   : > { %v1735_v56 = vsel %vm344_vm0, %v1724_v48, 0.0  ;;  %v2245_v57 = vadd.f32 %v1674_v54, %v1083_v49 }
 0x13b   : > { %v1736_v58 = vadd.f32 %v1735_v56, %v1734_v52  ;;  %1698 = vst.msk [vmem:[%s2627_s7 + $0x38] sm:$0xff] %vm344_vm0, %v2244_v53  ;;  %v1709_v59 = vadd.f32 %v1708_v55, %v1707_v51  ;;  %v1727_v61 = vmul.f32 %v2244_v53, %v2244_v53  ;;  %v1712_v3 = vsel %vm344_vm0, %v2244_v53, 0.0 }
 0x13c   : > { %1697 = vst.msk [vmem:[%s2627_s7 + $0x30] sm:$0xff] %vm344_vm0, %v2245_v57  ;;  %v1710_v62 = vsel %vm344_vm0, %v2245_v57, 0.0  ;;  %v1726_v63 = vmul.f32 %v2245_v57, %v2245_v57 }
 0x13d   : > { %v1711_v0 = vadd.f32 %v1710_v62, %v1709_v59  ;;  %v1738_v2 = vadd.f32 %v1737_v60, %v1736_v58  ;;  %v1741_v7 = vsel %vm344_vm0, %v1727_v61, 0.0 }
 0x13e   : > { %v1739_v4 = vsel %vm344_vm0, %v1726_v63, 0.0 }
 0x13f   : > { %v1713_v5 = vadd.f32 %v1712_v3, %v1711_v0  ;;  %v1740_v6 = vadd.f32 %v1739_v4, %v1738_v2 }
 0x141   : > { %v1714_v8 = vrot.slane %v1713_v5, 4  ;;  %v1742_v9 = vadd.f32 %v1741_v7, %v1740_v6 }
 0x143   : > { %v1715_v1 = vadd.f32 %v1714_v8, %v1713_v5  ;;  %v1743_v10 = vrot.slane %v1742_v9, 4 }
 0x145   : > { %v1716_v11 = vrot.slane %v1715_v1, 2  ;;  %v1744_v12 = vadd.f32 %v1743_v10, %v1742_v9 }
 0x147   : > { %v1717_v13 = vadd.f32 %v1716_v11, %v1715_v1  ;;  %v1745_v14 = vrot.slane %v1744_v12, 2 }
 0x149   : > { %v1718_v15 = vrot.slane %v1717_v13, 1  ;;  %v1746_v16 = vadd.f32 %v1745_v14, %v1744_v12 }
 0x14b   : > { %v1747_v17 = vrot.slane %v1746_v16, 1  ;;  %v1719_v18 = vadd.f32 %v1718_v15, %v1717_v13 }
 0x14d   : > { %v1748_v19 = vadd.f32 %v1747_v17, %v1746_v16 }
 0x14f   : > { %v1750_v20 = vsel %vm1749_vm2, %v1719_v18, %v1748_v19 }
 0x150   : > { %1752 = vst.msk [vmem:[%s293_s11] sm:$0x3] %vm346_vm1, %v1750_v20 }
 0x151 PF: > { %s17_s23 = sadd.s32 1, %s2349_s23   ;;  %s2682_s21 = smov %s2345_s22 }
 0x152   : > { %p14_p5 = scmp.ge.s32.totalorder %s17_s23, 4   ;;  %s2683_s22 = smov %s2685_s4 }
 0x154   :  { %16 = sbr.rel (!%p14_p5) target bundleno = 2 (0x2), region = 98 }

// kernel: _forward.7
= control target key start
LH: loop header
LB: loop body
LE: loop exit
PB: predicated region body
PF: predicated region fallthrough
CT: control target
= control target key end

     0   :  { %s86_s0 = inlined_call_operand.vmem [shape: f32[8,128], index: 0, kind: input, shape index: {}]   ;;  %s87_s1 = inlined_call_operand.vmem [shape: f32[8,128], index: 1, kind: input, shape index: {}]   ;;  %s88_s2 = inlined_call_operand.vmem [shape: f32[1,128], index: 2, kind: input, shape index: {}]   ;;  %s89_s3 = inlined_call_operand.vmem [shape: f32[1,128], index: 3, kind: input, shape index: {}]   ;;  %s90_s4 = inlined_call_operand.vmem [shape: f32[8,128], index: 4, kind: output, shape index: {}]  }
   0x1   :  { %v17_v0 = vld [vmem:[%s86_s0] sm:$0xff] }
   0x2   :  { %v44_v1 = vld [vmem:[%s88_s2] ss:$0 sm:$0xff] }
   0x3   :  { %v45_v2 = vld [vmem:[%s89_s3] ss:$0 sm:$0xff]  ;;  %v25_v3 = vmul.f32 %v44_v1, %v17_v0 }
   0x4   :  { %v34_v4 = vld [vmem:[%s87_s1] sm:$0xff] }
   0x5   :  { %v33_v5 = vadd.f32 %v45_v2, %v25_v3 }
   0x7   :  { %v35_v6 = vadd.f32 %v34_v4, %v33_v5 }
   0x9   :  { %vm36_vm0 = vcmp.gt.f32.partialorder %v35_v6, 0.0  ;;  %v37_v7 = vmul.f32 0.01, %v35_v6 }
   0xb   :  { %v38_v8 = vsel %vm36_vm0, %v35_v6, %v37_v7 }
   0xc   :  { %39 = vst [vmem:[%s90_s4] sm:$0xff] %v38_v8 }

// kernel: _forward.6
= control target key start
LH: loop header
LB: loop body
LE: loop exit
PB: predicated region body
PF: predicated region fallthrough
CT: control target
= control target key end

     0   :  { %12 = vsyncpa [#allocation4], 0  ;;  %s1066_s0 = inlined_call_operand.vmem [shape: f32[2,8,8,16], index: 0, kind: input, shape index: {}]   ;;  %s1067_s1 = inlined_call_operand.vmem [shape: f32[1,16,8], index: 1, kind: input, shape index: {}]   ;;  %s1068_s2 = inlined_call_operand.vmem [shape: f32[1,16], index: 2, kind: input, shape index: {}]   ;;  %s1069_s3 = inlined_call_operand.vmem [shape: f32[1,16], index: 3, kind: input, shape index: {}]   ;;  %s1070_s4 = inlined_call_operand.vmem [shape: f32[1,8], index: 4, kind: input, shape index: {}]   ;;  %s1071_s5 = inlined_call_operand.vmem [shape: f32[2,8,8,8], index: 5, kind: output, shape index: {0}]   ;;  %s1072_s6 = inlined_call_operand.hbm [shape: f32[2,1,2,8], index: 6, kind: output, shape index: {1}]  }
   0x1   :  { %14 = vsyncpa [#allocation4 + $0x1], 0  ;;  %s885_s21 = smov 0   ;;  %s887_s22 = smov 0  }
   0x2   :  { %s889_s23 = smov 0   ;;  %s891_s2 = smov 0  }
   0x3   :  { %s893_s3 = smov 0   ;;  %s895_s24 = smov 0  }
   0x4 LB: > { %s657_s25 = sadd.s32 4294967295, %s847_s24   ;;  %s658_s26 = sadd.s32 4294967294, %s847_s24   ;;  %s847_s24 = sphi %s895_s24, %s20_s24   ;;  %s843_s3 = sphi %s893_s3, %s1079_s3   ;;  %s839_s2 = sphi %s891_s2, %s1078_s2   ;;  %s835_s23 = sphi %s889_s23, %s1077_s23   ;;  %s831_s22 = sphi %s887_s22, %s1076_s22   ;;  %s827_s21 = sphi %s885_s21, %s1075_s21  }
   0x5   : > { %s32_s27 = sadd.s32 1, %s843_s3  ;;  %s179_s28 = sadd.s32 1, %s835_s23 }
   0x6   : > { %p34_p0 = scmp.ge.s32.totalorder %s32_s27, 2  ;;  %p189_p1 = scmp.ne.s32.totalorder %s835_s23, %s831_s22 }
   0x7   : > { %p190_p2 = scmp.eq.s32.totalorder %s657_s25, 1  ;;  %p195_p3 = scmp.ne.s32.totalorder %s831_s22, %s827_s21 }
   0x8   : > { %s1081_s27 = smov (%p34_p0, %s32_s27), 0  ;;  %p196_p5 = scmp.eq.s32.totalorder %s658_s26, 1 }
   0x9   : > { %p925_p4 = por %p190_p2, %p189_p1  ;;  %s174_s30 = ssub.s32 %s843_s3, %s1081_s27 }
   0xa   : > { %p661_p6 = scmp.ge.s32.totalorder %s847_s24, 1  ;;  %p177_p7 = scmp.eq.s32.totalorder %s174_s30, 0 }
   0xb   : > { %p932_p8 = por %p196_p5, %p195_p3  ;;  %p234_p9 = scmp.lt.s32.totalorder %s847_s24, 3 }
   0xc   : > { %s938_s8 = scalar_select %p177_p7, %s835_s23, %s179_s28  }
   0xd   : > { %p235_p10 = pnand %p661_p6, %p234_p9 }
   0xe   : > { %v320_v0 = vld [vmem:[%s1067_s1] sm:$0xff] (!%p235_p10)  ;;  %v321_v1 = vld [vmem:[%s1067_s1 + $0x8] sm:$0xff] (!%p235_p10)  ;;  %p273_p11 = scmp.lt.s32.totalorder (!%p235_p10), %s839_s2, 1  ;;  %vm300_vm0 = vcmask (!%p235_p10), 130048   ;;  %vm459_vm1 = vcmask (!%p235_p10), 64512   ;;  %s270_s28 = sand.u32 (!%p235_p10), 1, %s831_s22  }
   0xf   : > { %238 = sbr.rel (%p235_p10) target bundleno = 297 (0x129), region = 40  ;;  %v708_v2 = vpack.c.bf16 (!%p235_p10), %v321_v1, %v320_v0  ;;  %v667_v19 = vld [vmem:[%s1070_s4] ss:$0 sm:$0xff] (!%p235_p10)  ;;  %s662_s30 = sshll.u32 (!%p235_p10), %s270_s28, 1  ;;  %vm518_vm2 = vcmask (!%p235_p10), 1040384   ;;  %vm520_vm3 = vcmask (!%p235_p10), 58368  }
  0x10   : > { %s677_s9 = sshll.u32 (!%p235_p10), %s839_s2, 5  ;;  %s272_s10 = scalar_lea.vmem (!%p235_p10), [#allocation3], %s662_s30 }
  0x11   : > { %709 = vmatprep.subr.bf16.mxu0 (!%p235_p10), %v708_v2  ;;  %712 = vmatprep.subr.bf16.mxu1 (!%p235_p10), %v708_v2  ;;  %s550_s11 = sshll.u32 (!%p235_p10), %s272_s10, 4  ;;  %s532_s15 = scalar_lea.sflag (!%p235_p10), [#allocation4], %s270_s28  ;;  %s1021_s11 = int_to_ptr.vmem [resolvable:$true] %s550_s11 }
  0x12   : > { %711 = vmatpush3.bf16.msra.mxu0 (!%p235_p10), %v708_v2  ;;  %713 = vmatpush3.bf16.msra.mxu1 (!%p235_p10), %v708_v2  ;;  %s849_s16 = smov (!%p235_p10), [#allocation3]  }
  0x16   : > { %s948_s13 = scalar_select %p273_p11, %s839_s2, 1 }
  0x17   : > { %s769_s2 = scalar_lea.vmem %s1021_s11, 32 }
  0x18   : > { %s680_s14 = sshll.u32 %s948_s13, 6  ;;  %p770_p12 = scmp.ne.s32.totalorder %s1021_s11, %s769_s2 }
  0x19   : > { %s277_s17 = scalar_lea.vmem %s1066_s0, %s680_s14  ;;  %s980_s26 = scalar_lea.vmem %s1071_s5, %s680_s14 }
  0x1a   : > { %v292_v3 = vld [vmem:[%s277_s17] sm:$0xff]  ;;  %v293_v4 = vld [vmem:[%s277_s17 + $0x8] sm:$0xff]  ;;  %v294_v5 = vld [vmem:[%s277_s17 + $0x10] sm:$0xff]  ;;  %s1019_s14 = scalar_lea.hbm %s1072_s6, %s677_s9  ;;  %p771_p13 = pnand %p770_p12, %p925_p4 }
  0x1b   : > { %301 = vst.msk [vmem:[#allocation2] sm:$0xff] %vm300_vm0, %v292_v3  ;;  %302 = vst.msk [vmem:[#allocation2 + $0x8] sm:$0xff] %vm300_vm0, %v293_v4  ;;  %v295_v6 = vld [vmem:[%s277_s17 + $0x18] sm:$0xff]  ;;  %v296_v7 = vld [vmem:[%s277_s17 + $0x20] sm:$0xff] }
  0x1c   : > { %303 = vst.msk [vmem:[#allocation2 + $0x10] sm:$0xff] %vm300_vm0, %v294_v5  ;;  %v297_v8 = vld [vmem:[%s277_s17 + $0x28] sm:$0xff]  ;;  %304 = vst.msk [vmem:[#allocation2 + $0x18] sm:$0xff] %vm300_vm0, %v295_v6  ;;  %v298_v9 = vld [vmem:[%s277_s17 + $0x30] sm:$0xff]  ;;  %p772_p0 = pneg %p771_p13 }
  0x1d   : > { %305 = vst.msk [vmem:[#allocation2 + $0x20] sm:$0xff] %vm300_vm0, %v296_v7  ;;  %306 = vst.msk [vmem:[#allocation2 + $0x28] sm:$0xff] %vm300_vm0, %v297_v8  ;;  %v299_v10 = vld [vmem:[%s277_s17 + $0x38] sm:$0xff]  ;;  %s773_s17 = sshll.u32 %s849_s16, 4  ;;  %s774_s17 = int_to_ptr.vmem [resolvable:$false] %s773_s17 }
  0x1e   : > { %307 = vst.msk [vmem:[#allocation2 + $0x30] sm:$0xff] %vm300_vm0, %v298_v9  ;;  %308 = vst.msk [vmem:[#allocation2 + $0x38] sm:$0xff] %vm300_vm0, %v299_v10  ;;  %s775_s18 = scalar_lea.vmem %s774_s17, 64  ;;  %p776_p1 = scmp.lt.s32.totalorder %s1021_s11, %s774_s17 }
  0x1f   : > { %p777_p2 = scmp.lt.s32.totalorder %s775_s18, %s769_s2 }
  0x21   : > { %p778_p3 = por %p777_p2, %p776_p1 }
  0x22   : > { %v312_v11 = vld [vmem:[#allocation2] sm:$0xff]  ;;  %v313_v12 = vld [vmem:[#allocation2 + $0x8] sm:$0xff] }
  0x23   : > { %v314_v13 = vld [vmem:[#allocation2 + $0x10] sm:$0xff]  ;;  %696 = vmatprep.mubr.msk.f32.mxu0 %vm300_vm0, %v312_v11  ;;  %v315_v17 = vld [vmem:[#allocation2 + $0x18] sm:$0xff]  ;;  %p779_p5 = pnand %p778_p3, %p772_p0 }
  0x24   : > { %v316_v14 = vld [vmem:[#allocation2 + $0x20] sm:$0xff]  ;;  %v317_v15 = vld [vmem:[#allocation2 + $0x28] sm:$0xff]  ;;  %697 = vmatmul.mubr.msk.f32.vlgmr.msra.gmra.mrb[0].mxu0 %vm300_vm0, %v313_v12 }
  0x25   : > { %702 = vmatprep.mubr.msk.f32.mxu1 %vm300_vm0, %v316_v14  ;;  %v318_v16 = vld [vmem:[#allocation2 + $0x30] sm:$0xff]  ;;  %699 = vmatprep.mubr.msk.f32.mxu0 %vm300_vm0, %v314_v13  ;;  %v319_v18 = vld [vmem:[#allocation2 + $0x38] sm:$0xff] }
  0x26   : > { %703 = vmatmul.mubr.msk.f32.vlgmr.msra.gmra.mrb[0].mxu1 %vm300_vm0, %v317_v15 }
  0x27   : > { %705 = vmatprep.mubr.msk.f32.mxu1 %vm300_vm0, %v318_v16 }
  0x28   : > { %700 = vmatmul.mubr.msk.f32.gmra.mrb[2].mxu0 %vm300_vm0, %v315_v17 }
  0x2a   : > { %706 = vmatmul.mubr.msk.f32.gmra.mrb[2].mxu1 %vm300_vm0, %v319_v18 }
  0xf7   : > { %v698_v20 = vpop.f32.mrb[0].mxu0 }
  0xf8   : > { %v426_v21 = vadd.f32 %v698_v20, %v667_v19  ;;  %v420_v22 = vpop.f32.mrb[1].mxu0 }
  0xf9   : > { %v704_v23 = vpop.f32.mrb[0].mxu1  ;;  %v421_v24 = vadd.f32 %v667_v19, %v420_v22 }
  0xfa   : > { %v446_v25 = vadd.f32 %v704_v23, %v667_v19  ;;  %v440_v26 = vpop.f32.mrb[1].mxu1  ;;  %461 = vst.msk [vmem:[%s980_s26 + $0x8] sm:$0xff] %vm459_vm1, %v426_v21  ;;  %v469_v27 = vsel %vm459_vm1, %v426_v21, 0.0  ;;  %v490_v28 = vmul.f32 %v426_v21, %v426_v21 }
  0xfb   : > { %v441_v29 = vadd.f32 %v667_v19, %v440_v26  ;;  %460 = vst.msk [vmem:[%s980_s26] sm:$0xff] %vm459_vm1, %v421_v24  ;;  %v468_v30 = vsel %vm459_vm1, %v421_v24, 0.0  ;;  %v489_v31 = vmul.f32 %v421_v24, %v421_v24  ;;  %v701_v32 = vpop.f32.mrb[2].mxu0 }
  0xfc   : > { %465 = vst.msk [vmem:[%s980_s26 + $0x28] sm:$0xff] %vm459_vm1, %v446_v25  ;;  %v498_v33 = vsel %vm459_vm1, %v490_v28, 0.0  ;;  %v470_v34 = vadd.f32 %v469_v27, %v468_v30  ;;  %v436_v35 = vadd.f32 %v701_v32, %v667_v19  ;;  %v430_v36 = vpop.f32.mrb[3].mxu0  ;;  %v494_v55 = vmul.f32 %v446_v25, %v446_v25 }
  0xfd   : > { %464 = vst.msk [vmem:[%s980_s26 + $0x20] sm:$0xff] %vm459_vm1, %v441_v29  ;;  %v707_v37 = vpop.f32.mrb[2].mxu1  ;;  %v497_v38 = vsel %vm459_vm1, %v489_v31, 0.0  ;;  %v431_v39 = vadd.f32 %v667_v19, %v430_v36  ;;  %v493_v42 = vmul.f32 %v441_v29, %v441_v29  ;;  %v475_v51 = vsel %vm459_vm1, %v441_v29, 0.0 }
  0xfe   : > { %v450_v40 = vpop.f32.mrb[3].mxu1  ;;  %v499_v41 = vadd.f32 %v498_v33, %v497_v38  ;;  %463 = vst.msk [vmem:[%s980_s26 + $0x18] sm:$0xff] %vm459_vm1, %v436_v35  ;;  %v456_v43 = vadd.f32 %v707_v37, %v667_v19  ;;  %v492_v44 = vmul.f32 %v436_v35, %v436_v35  ;;  %v473_v49 = vsel %vm459_vm1, %v436_v35, 0.0 }
  0xff   : > { %462 = vst.msk [vmem:[%s980_s26 + $0x10] sm:$0xff] %vm459_vm1, %v431_v39  ;;  %v471_v45 = vsel %vm459_vm1, %v431_v39, 0.0  ;;  %v491_v46 = vmul.f32 %v431_v39, %v431_v39  ;;  %v451_v47 = vadd.f32 %v667_v19, %v450_v40  ;;  %v504_v56 = vsel %vm459_vm1, %v493_v42, 0.0 }
 0x100   : > { %v472_v48 = vadd.f32 %v471_v45, %v470_v34  ;;  %467 = vst.msk [vmem:[%s980_s26 + $0x38] sm:$0xff] %vm459_vm1, %v456_v43  ;;  %v502_v54 = vsel %vm459_vm1, %v492_v44, 0.0  ;;  %v477_v60 = vsel %vm459_vm1, %v446_v25, 0.0  ;;  %v506_v0 = vsel %vm459_vm1, %v494_v55, 0.0 }
 0x101   : > { %v500_v50 = vsel %vm459_vm1, %v491_v46, 0.0  ;;  %466 = vst.msk [vmem:[%s980_s26 + $0x30] sm:$0xff] %vm459_vm1, %v451_v47  ;;  %v495_v57 = vmul.f32 %v451_v47, %v451_v47  ;;  %v479_v61 = vsel %vm459_vm1, %v451_v47, 0.0  ;;  %v496_v1 = vmul.f32 %v456_v43, %v456_v43 }
 0x102   : > { %v501_v52 = vadd.f32 %v500_v50, %v499_v41  ;;  %v474_v53 = vadd.f32 %v473_v49, %v472_v48  ;;  %v481_v5 = vsel %vm459_vm1, %v456_v43, 0.0 }
 0x103   : > { %v508_v2 = vsel %vm459_vm1, %v495_v57, 0.0  ;;  %v510_v8 = vsel %vm459_vm1, %v496_v1, 0.0 }
 0x104   : > { %v476_v58 = vadd.f32 %v475_v51, %v474_v53  ;;  %v503_v59 = vadd.f32 %v502_v54, %v501_v52 }
 0x106   : > { %v505_v62 = vadd.f32 %v504_v56, %v503_v59  ;;  %v478_v63 = vadd.f32 %v477_v60, %v476_v58 }
 0x108   : > { %v480_v3 = vadd.f32 %v479_v61, %v478_v63  ;;  %v507_v4 = vadd.f32 %v506_v0, %v505_v62 }
 0x10a   : > { %v482_v6 = vadd.f32 %v481_v5, %v480_v3  ;;  %v509_v7 = vadd.f32 %v508_v2, %v507_v4 }
 0x10c   : > { %v483_v9 = vrot.slane %v482_v6, 4  ;;  %v511_v10 = vadd.f32 %v510_v8, %v509_v7 }
 0x10e   : > { %v484_v11 = vadd.f32 %v483_v9, %v482_v6  ;;  %v512_v12 = vrot.slane %v511_v10, 4 }
 0x110   : > { %v485_v13 = vrot.slane %v484_v11, 2  ;;  %v513_v14 = vadd.f32 %v512_v12, %v511_v10 }
 0x112   : > { %v486_v15 = vadd.f32 %v485_v13, %v484_v11  ;;  %v514_v16 = vrot.slane %v513_v14, 2 }
 0x114   : > { %v487_v17 = vrot.slane %v486_v15, 1  ;;  %v515_v18 = vadd.f32 %v514_v16, %v513_v14 }
 0x116   : > { %v516_v19 = vrot.slane %v515_v18, 1  ;;  %v488_v20 = vadd.f32 %v487_v17, %v486_v15 }
 0x118   : > { %v517_v21 = vadd.f32 %v516_v19, %v515_v18 }
 0x11a   : > { %v519_v22 = vsel %vm518_vm2, %v488_v20, %v517_v21 }
 0x11b   : > { %521 = vst.msk [vmem:[%s272_s10] sm:$0x3] %vm520_vm3, %v519_v22 }
 0x11c   : > { %782 = shalt.err (!%p779_p5)
}
 0x11d   : > { %s783_s19 = scalar_lea.hbm %s1019_s14, 32  ;;  %s787_s26 = scalar_lea.hbm %s1072_s6, 64 }
 0x11e   : > { %p784_p6 = scmp.ne.s32.totalorder %s1019_s14, %s783_s19  ;;  %p788_p10 = scmp.lt.u32.totalorder %s1019_s14, %s1072_s6 }
 0x11f   : > { %p789_p11 = scmp.lt.u32.totalorder %s787_s26, %s783_s19  ;;  %p791_p13 = scmp.lt.u32.totalorder %s783_s19, %s1019_s14 }
 0x120   : > { %p785_p7 = pnand %p784_p6, %p925_p4 }
 0x121   : > { %p790_p12 = por %p789_p11, %p788_p10 }
 0x122   : > { %p786_p9 = pneg %p785_p7 }
 0x123   : > { %p792_p0 = por %p791_p13, %p790_p12 }
 0x125   : > { %p793_p1 = pnand %p792_p0, %p786_p9 }
 0x127   : > { %796 = shalt.err (!%p793_p1)
}
 0x128   : > { %714 = dma.vmem_to_hbm [thread:$0]  (%p925_p4), %s1021_s11, 32, %s1019_s14, %s532_s15  }
 0x129 PF: > { %p720_p2 = scmp.ge.s32.totalorder %s847_s24, 2  ;;  %s574_s9 = sand.u32 1, %s827_s21  }
 0x12a   : > { %s575_s10 = scalar_lea.sflag [#allocation4], %s574_s9 }
 0x12b   : > { %p717_p3 = pnand %p720_p2, %p932_p8 }
 0x12d   : > { %822 = dma.done.wait (!%p717_p3), %s575_s10, 32  }
 0x12e   : > { %824 = vsyncadd (!%p717_p3), %s575_s10, 4294967264  ;;  %s20_s24 = sadd.s32 1, %s847_s24   ;;  %s1075_s21 = smov %s831_s22 }
 0x12f   : > { %p17_p5 = scmp.ge.s32.totalorder %s20_s24, 4   ;;  %s1076_s22 = smov %s835_s23 }
 0x130   : > { %s1077_s23 = smov %s938_s8  ;;  %s1078_s2 = smov %s843_s3 }
 0x131   : > { %s1079_s3 = smov %s1081_s27  ;;  %19 = sbr.rel (!%p17_p5) target bundleno = 4 (0x4), region = 92 }
 0x138   :  { %580 = vsyncpa [#allocation4], 1 }
 0x139   :  { %582 = vsyncpa [#allocation4 + $0x1], 1 }

</bundles_post_ra>
